<compile_context>
chip_gen: v7x
topology: tpu7x:2x2x1
jax: 0.10.0
libtpu: 0.0.40
codegen_flags: <defaults>
</compile_context>

<pallas_src>
import functools

import jax
import jax.numpy as jnp
from jax.experimental import pallas as pl
from jax.experimental.pallas import tpu as pltpu


# ----------------------------- in-kernel math helpers -----------------------------

def _gelu(x):
    # tanh-approximate GELU: jnp.tanh lowers to the EUP (separate bundle slot)
    # instead of an erf polynomial on the VALU.
    c = 0.7978845608028654  # sqrt(2/pi)
    return 0.5 * x * (1.0 + jnp.tanh(c * (x + 0.044715 * x * x * x)))


def _softmax(x):
    m = jnp.max(x, axis=-1, keepdims=True)
    e = jnp.exp(x - m)
    # denominator >= 1 (contains exp(0)); EUP approx reciprocal is safe here.
    return e * pl.reciprocal(jnp.sum(e, axis=-1, keepdims=True), approx=True)


def _layer_norm(x, gamma, beta, eps=1e-5):
    mu = jnp.mean(x, axis=-1, keepdims=True)
    xc = x - mu
    var = jnp.mean(xc * xc, axis=-1, keepdims=True)
    return xc * jax.lax.rsqrt(var + eps) * gamma + beta


# ----------------------------------- the kernel ------------------------------------

def _block_kernel(n_heads, head_dim, num_experts, active_experts, hid,
                  x_ref, wq_ref, bq_ref, wk_ref, bk_ref, wv_ref, bv_ref,
                  wo_ref, bo_ref, g_ref, beta_ref, wr_ref, br_ref,
                  w1_ref, b1_ref, w2_ref, b2_ref,
                  out_ref, attn_ref, ctx_scratch):
    f32, bf16 = jnp.float32, jnp.bfloat16
    H, Dh = n_heads, head_dim

    x = x_ref[...]                                   # (T, C) f32 slab for this batch element
    T, C = x.shape
    xb = jnp.broadcast_to(x.astype(bf16)[None], (H, T, C))   # head-batched activations

    # ---------- fused multi-head causal self-attention (batched over heads) ----------
    # wq/bq already carry the 1/sqrt(Dh) scale (folded at parameter-init time).
    q = jnp.einsum("htc,hcd->htd", xb, wq_ref[...], preferred_element_type=f32) + bq_ref[...]
    k = jnp.einsum("htc,hcd->htd", xb, wk_ref[...], preferred_element_type=f32) + bk_ref[...]
    v = jnp.einsum("htc,hcd->htd", xb, wv_ref[...], preferred_element_type=f32) + bv_ref[...]

    row = jax.lax.broadcasted_iota(jnp.int32, (T, T), 0)
    col = jax.lax.broadcasted_iota(jnp.int32, (T, T), 1)
    causal = (col <= row)[None]                      # (1, T, T) broadcast over heads

    s = jnp.einsum("hqd,hkd->hqk", q.astype(bf16), k.astype(bf16),
                   preferred_element_type=f32)       # (H, T, T)
    p = _softmax(jnp.where(causal, s, -jnp.inf))     # (H, T, T) attention probs
    # TODO(synk): at large T this f32 (B,H,T,T) writeback dominates HBM traffic —
    # emit bf16 / drop it / go flash-style when probs are not consumed downstream.
    attn_ref[...] = p.astype(attn_ref.dtype)         # single slab store per step

    ctx = jnp.einsum("hqk,hkd->hqd", p.astype(bf16), v.astype(bf16),
                     preferred_element_type=f32)     # (H, T, Dh)
    # Lay heads out as contiguous columns so the output projection is ONE
    # (T,C)@(C,C) dot (contraction = C) instead of H narrow (T,Dh)@(Dh,C) dots.
    for h in range(H):
        ctx_scratch[:, h * Dh:(h + 1) * Dh] = ctx[h]
    y = jnp.dot(ctx_scratch[...].astype(bf16), wo_ref[...],
                preferred_element_type=f32) + bo_ref[...]

    # ---------- residual + layernorm (reference reuses ONE LayerNorm twice) ----------
    gamma, beta = g_ref[...], beta_ref[...]
    x1n = _layer_norm(y + x, gamma, beta)            # "add_normed"
    x1n_bf = x1n.astype(bf16)

    # ---------- TopkRouter ----------
    logits = jnp.dot(x1n_bf, wr_ref[...], preferred_element_type=f32) + br_ref[...]
    scores = _softmax(logits)                        # (T, E)
    work = scores
    kth = scores
    for _ in range(active_experts):                  # k-th largest via iterated max removal
        kth = jnp.max(work, axis=-1, keepdims=True)
        work = jnp.where(work >= kth, -jnp.inf, work)
    router_w = _softmax(jnp.where(scores >= kth, scores, -jnp.inf))   # (T, E)

    # ---------- experts (dense, like the reference) ----------
    # Layer 1 fused across experts: one (T,C)@(C,E*4C) matmul, lane-dense GELU.
    # TODO(synk): for realistic E, use router-derived gather (PrefetchScalarGridSpec)
    # so only active_experts are computed/streamed; dense all-expert compute kept here
    # to match the reference exactly.
    h1 = _gelu(jnp.dot(x1n_bf, w1_ref[...], preferred_element_type=f32) + b1_ref[...])
    h1_bf = h1.astype(bf16)                          # (T, E*hid)
    moe = jnp.zeros((T, C), f32)
    for e in range(num_experts):                     # layer 2: full-width (hid) contraction
        oe = jnp.dot(h1_bf[:, e * hid:(e + 1) * hid], w2_ref[e],
                     preferred_element_type=f32) + b2_ref[e]
        moe = moe + router_w[:, e:e + 1] * oe

    # ---------- residual + final layernorm (same gamma/beta) ----------
    out_ref[...] = _layer_norm(moe + x1n, gamma, beta).astype(out_ref.dtype)


# ----------------------------------- wrapper ---------------------------------------

def init_params(key, embed_size, n_heads, num_experts):
    C, H, E = embed_size, n_heads, num_experts
    Dh = C // H
    hid = 4 * C
    ks = jax.random.split(key, 16)

    def w(k, shape):
        return jax.random.normal(k, shape, jnp.float32) * 0.02

    bf16 = jnp.bfloat16
    attn_scale = 1.0 / (Dh ** 0.5)
    # Fold the 1/sqrt(head_dim) attention scale into wq/bq (offline weight transform).
    wq = (w(ks[0], (H, C, Dh)) * attn_scale).astype(bf16)
    bq = w(ks[1], (H, 1, Dh)) * attn_scale

    return dict(
        # attention: per-head stacked projections (H, C, Dh); output proj (C, C)
        wq=wq, bq=bq,
        wk=w(ks[2], (H, C, Dh)).astype(bf16), bk=w(ks[3], (H, 1, Dh)),
        wv=w(ks[4], (H, C, Dh)).astype(bf16), bv=w(ks[5], (H, 1, Dh)),
        wo=w(ks[6], (C, C)).astype(bf16), bo=w(ks[7], (1, C)),
        # shared LayerNorm params (the reference reuses one LayerNorm twice)
        gamma=jnp.ones((1, C), jnp.float32), beta=jnp.zeros((1, C), jnp.float32),
        # router
        wr=w(ks[8], (C, E)).astype(bf16), br=w(ks[9], (1, E)),
        # experts: layer-1 weights fused along the output axis (C, E*4C); layer-2 (E, 4C, C)
        w1=w(ks[10], (C, E * hid)).astype(bf16), b1=w(ks[11], (1, E * hid)),
        w2=w(ks[12], (E, hid, C)).astype(bf16), b2=w(ks[13], (E, 1, C)),
    )


def block_forward(x, params, n_heads, num_experts, active_experts):
    B, T, C = x.shape
    H = n_heads
    assert C % H == 0
    Dh = C // H
    hid = 4 * C

    kern = functools.partial(_block_kernel, H, Dh, num_experts, active_experts, hid)

    weight_names = ("wq", "bq", "wk", "bk", "wv", "bv", "wo", "bo",
                    "gamma", "beta", "wr", "br", "w1", "b1", "w2", "b2")
    weights = [params[n] for n in weight_names]

    # Whole weight arrays resident in VMEM, identical block for every grid step.
    # TODO(synk): for real sizes tile w1/w2 over an expert grid axis (and a T-tile
    # axis) so the per-step weight footprint fits v7x's 64 MiB VMEM without 2x
    # double-buffering of constant-index weights.
    def full_spec(a):
        return pl.BlockSpec(a.shape, lambda b, n=a.ndim: (0,) * n)

    in_specs = [pl.BlockSpec((None, T, C), lambda b: (b, 0, 0))] + \
               [full_spec(a) for a in weights]
    out_specs = [
        pl.BlockSpec((None, T, C), lambda b: (b, 0, 0)),
        pl.BlockSpec((None, H, T, T), lambda b: (b, 0, 0, 0)),
    ]
    out_shape = (
        jax.ShapeDtypeStruct((B, T, C), jnp.float32),
        jax.ShapeDtypeStruct((B, H, T, T), jnp.float32),
    )

    fn = pl.pallas_call(
        kern,
        grid=(B,),
        in_specs=in_specs,
        out_specs=out_specs,
        out_shape=out_shape,
        scratch_shapes=[pltpu.VMEM((T, C), jnp.float32)],   # concat-heads context slab
        compiler_params=pltpu.CompilerParams(
            dimension_semantics=("parallel",),
            vmem_limit_bytes=64 * 1024 * 1024,
        ),
    )
    return fn(x, *weights)


# ------------------------------------- main -----------------------------------------

if __name__ == "__main__":
    embed_size, n_heads, seq_len = 32, 4, 8
    num_experts, active_experts = 4, 2
    batch = 2

    key = jax.random.PRNGKey(0)
    pkey, xkey = jax.random.split(key)

    params = init_params(pkey, embed_size, n_heads, num_experts)
    x = jax.random.normal(xkey, (batch, seq_len, embed_size), jnp.float32)

    out, attn = block_forward(x, params, n_heads, num_experts, active_experts)
    jax.block_until_ready((out, attn))

    assert out.shape == (batch, seq_len, embed_size)
    assert attn.shape == (batch, n_heads, seq_len, seq_len)
    assert bool(jnp.all(jnp.isfinite(out)))
    assert bool(jnp.all(jnp.isfinite(attn)))
    # attention rows should (approximately) sum to 1
    assert bool(jnp.all(jnp.abs(jnp.sum(attn, axis=-1) - 1.0) < 1e-2))
    # causal mask: strictly-upper-triangular probs must be exactly zero
    tri = jnp.triu(jnp.ones((seq_len, seq_len)), k=1)[None, None]
    assert bool(jnp.all(jnp.where(tri > 0, attn, 0.0) == 0.0))
    print("KERNEL_OK")
</pallas_src>

<mosaic_0001>
module attributes {stable_mosaic.version = 11 : i64} {
  func.func @_block_kernel(%arg0: i32, %arg1: memref<1x8x32xf32, #tpu.memory_space<vmem>>, %arg2: memref<4x32x8xbf16, #tpu.memory_space<vmem>>, %arg3: memref<4x1x8xf32, #tpu.memory_space<vmem>>, %arg4: memref<4x32x8xbf16, #tpu.memory_space<vmem>>, %arg5: memref<4x1x8xf32, #tpu.memory_space<vmem>>, %arg6: memref<4x32x8xbf16, #tpu.memory_space<vmem>>, %arg7: memref<4x1x8xf32, #tpu.memory_space<vmem>>, %arg8: memref<32x32xbf16, #tpu.memory_space<vmem>>, %arg9: memref<1x32xf32, #tpu.memory_space<vmem>>, %arg10: memref<1x32xf32, #tpu.memory_space<vmem>>, %arg11: memref<1x32xf32, #tpu.memory_space<vmem>>, %arg12: memref<32x4xbf16, #tpu.memory_space<vmem>>, %arg13: memref<1x4xf32, #tpu.memory_space<vmem>>, %arg14: memref<32x512xbf16, #tpu.memory_space<vmem>>, %arg15: memref<1x512xf32, #tpu.memory_space<vmem>>, %arg16: memref<4x128x32xbf16, #tpu.memory_space<vmem>>, %arg17: memref<4x1x32xf32, #tpu.memory_space<vmem>>, %arg18: memref<1x8x32xf32, #tpu.memory_space<vmem>>, %arg19: memref<1x4x8x8xf32, #tpu.memory_space<vmem>>, %arg20: memref<8x32xf32, #tpu.memory_space<vmem>>) attributes {dimension_semantics = [#tpu.dimension_semantics<parallel>], iteration_bounds = array<i64: 2>, scalar_prefetch = 0 : i64, scratch_operands = 1 : i64, tpu.core_type = #tpu.core_type<tc>, window_params = [{transform_indices = @transform_0, window_bounds = array<i64: 1, 8, 32>}, {pipeline_mode = #tpu.pipeline_mode<synchronous>, transform_indices = @transform_1, window_bounds = array<i64: 4, 32, 8>}, {pipeline_mode = #tpu.pipeline_mode<synchronous>, transform_indices = @transform_2, window_bounds = array<i64: 4, 1, 8>}, {pipeline_mode = #tpu.pipeline_mode<synchronous>, transform_indices = @transform_3, window_bounds = array<i64: 4, 32, 8>}, {pipeline_mode = #tpu.pipeline_mode<synchronous>, transform_indices = @transform_4, window_bounds = array<i64: 4, 1, 8>}, {pipeline_mode = #tpu.pipeline_mode<synchronous>, transform_indices = @transform_5, window_bounds = array<i64: 4, 32, 8>}, {pipeline_mode = #tpu.pipeline_mode<synchronous>, transform_indices = @transform_6, window_bounds = array<i64: 4, 1, 8>}, {pipeline_mode = #tpu.pipeline_mode<synchronous>, transform_indices = @transform_7, window_bounds = array<i64: 32, 32>}, {pipeline_mode = #tpu.pipeline_mode<synchronous>, transform_indices = @transform_8, window_bounds = array<i64: 1, 32>}, {pipeline_mode = #tpu.pipeline_mode<synchronous>, transform_indices = @transform_9, window_bounds = array<i64: 1, 32>}, {pipeline_mode = #tpu.pipeline_mode<synchronous>, transform_indices = @transform_10, window_bounds = array<i64: 1, 32>}, {pipeline_mode = #tpu.pipeline_mode<synchronous>, transform_indices = @transform_11, window_bounds = array<i64: 32, 4>}, {pipeline_mode = #tpu.pipeline_mode<synchronous>, transform_indices = @transform_12, window_bounds = array<i64: 1, 4>}, {pipeline_mode = #tpu.pipeline_mode<synchronous>, transform_indices = @transform_13, window_bounds = array<i64: 32, 512>}, {pipeline_mode = #tpu.pipeline_mode<synchronous>, transform_indices = @transform_14, window_bounds = array<i64: 1, 512>}, {pipeline_mode = #tpu.pipeline_mode<synchronous>, transform_indices = @transform_15, window_bounds = array<i64: 4, 128, 32>}, {pipeline_mode = #tpu.pipeline_mode<synchronous>, transform_indices = @transform_16, window_bounds = array<i64: 4, 1, 32>}, {transform_indices = @transform_17, window_bounds = array<i64: 1, 8, 32>}, {transform_indices = @transform_18, window_bounds = array<i64: 1, 4, 8, 8>}]} {
    %c0 = arith.constant 0 : index
    %c0_0 = arith.constant 0 : index
    %c0_1 = arith.constant 0 : index
    %0 = vector.load %arg1[%c0, %c0_0, %c0_1] : memref<1x8x32xf32, #tpu.memory_space<vmem>>, vector<1x8x32xf32>
    %1 = vector.shape_cast %0 : vector<1x8x32xf32> to vector<8x32xf32>
    %2 = arith.truncf %1 : vector<8x32xf32> to vector<8x32xbf16>
    %3 = vector.shape_cast %2 : vector<8x32xbf16> to vector<1x8x32xbf16>
    %4 = vector.shape_cast %3 : vector<1x8x32xbf16> to vector<1x8x32xbf16>
    %5 = vector.broadcast %4 : vector<1x8x32xbf16> to vector<4x8x32xbf16>
    %c0_2 = arith.constant 0 : index
    %c0_3 = arith.constant 0 : index
    %c0_4 = arith.constant 0 : index
    %6 = vector.load %arg2[%c0_2, %c0_3, %c0_4] : memref<4x32x8xbf16, #tpu.memory_space<vmem>>, vector<4x32x8xbf16>
    "tpu.trace_start"() <{level = 10 : i32, message = "htc,hcd->htd"}> : () -> ()
    %cst = arith.constant dense<0.000000e+00> : vector<4x8x8xf32>
    %7 = tpu.matmul %5, %6, %cst {dimension_numbers = #tpu.dot_dimension_numbers<[2], [1], [1], [2], [0, 0, 0, 1, 1, 2], [0], [0]>} : vector<4x8x32xbf16>, vector<4x32x8xbf16>, vector<4x8x8xf32> -> vector<4x8x8xf32>
    "tpu.trace_stop"() : () -> ()
    %c0_5 = arith.constant 0 : index
    %c0_6 = arith.constant 0 : index
    %c0_7 = arith.constant 0 : index
    %8 = vector.load %arg3[%c0_5, %c0_6, %c0_7] : memref<4x1x8xf32, #tpu.memory_space<vmem>>, vector<4x1x8xf32>
    %9 = vector.broadcast %8 : vector<4x1x8xf32> to vector<4x8x8xf32>
    %10 = arith.addf %7, %9 : vector<4x8x8xf32>
    %c0_8 = arith.constant 0 : index
    %c0_9 = arith.constant 0 : index
    %c0_10 = arith.constant 0 : index
    %11 = vector.load %arg4[%c0_8, %c0_9, %c0_10] : memref<4x32x8xbf16, #tpu.memory_space<vmem>>, vector<4x32x8xbf16>
    "tpu.trace_start"() <{level = 10 : i32, message = "htc,hcd->htd"}> : () -> ()
    %cst_11 = arith.constant dense<0.000000e+00> : vector<4x8x8xf32>
    %12 = tpu.matmul %5, %11, %cst_11 {dimension_numbers = #tpu.dot_dimension_numbers<[2], [1], [1], [2], [0, 0, 0, 1, 1, 2], [0], [0]>} : vector<4x8x32xbf16>, vector<4x32x8xbf16>, vector<4x8x8xf32> -> vector<4x8x8xf32>
    "tpu.trace_stop"() : () -> ()
    %c0_12 = arith.constant 0 : index
    %c0_13 = arith.constant 0 : index
    %c0_14 = arith.constant 0 : index
    %13 = vector.load %arg5[%c0_12, %c0_13, %c0_14] : memref<4x1x8xf32, #tpu.memory_space<vmem>>, vector<4x1x8xf32>
    %14 = vector.broadcast %13 : vector<4x1x8xf32> to vector<4x8x8xf32>
    %15 = arith.addf %12, %14 : vector<4x8x8xf32>
    %c0_15 = arith.constant 0 : index
    %c0_16 = arith.constant 0 : index
    %c0_17 = arith.constant 0 : index
    %16 = vector.load %arg6[%c0_15, %c0_16, %c0_17] : memref<4x32x8xbf16, #tpu.memory_space<vmem>>, vector<4x32x8xbf16>
    "tpu.trace_start"() <{level = 10 : i32, message = "htc,hcd->htd"}> : () -> ()
    %cst_18 = arith.constant dense<0.000000e+00> : vector<4x8x8xf32>
    %17 = tpu.matmul %5, %16, %cst_18 {dimension_numbers = #tpu.dot_dimension_numbers<[2], [1], [1], [2], [0, 0, 0, 1, 1, 2], [0], [0]>} : vector<4x8x32xbf16>, vector<4x32x8xbf16>, vector<4x8x8xf32> -> vector<4x8x8xf32>
    "tpu.trace_stop"() : () -> ()
    %c0_19 = arith.constant 0 : index
    %c0_20 = arith.constant 0 : index
    %c0_21 = arith.constant 0 : index
    %18 = vector.load %arg7[%c0_19, %c0_20, %c0_21] : memref<4x1x8xf32, #tpu.memory_space<vmem>>, vector<4x1x8xf32>
    %19 = vector.broadcast %18 : vector<4x1x8xf32> to vector<4x8x8xf32>
    %20 = arith.addf %17, %19 : vector<4x8x8xf32>
    %21 = tpu.iota {dimensions = array<i32: 0>} : vector<8x8xi32>
    %22 = tpu.iota {dimensions = array<i32: 1>} : vector<8x8xi32>
    %23 = arith.cmpi sle, %22, %21 : vector<8x8xi32>
    %24 = vector.shape_cast %23 : vector<8x8xi1> to vector<1x8x8xi1>
    %25 = arith.truncf %10 : vector<4x8x8xf32> to vector<4x8x8xbf16>
    %26 = arith.truncf %15 : vector<4x8x8xf32> to vector<4x8x8xbf16>
    "tpu.trace_start"() <{level = 10 : i32, message = "hqd,hkd->hqk"}> : () -> ()
    %cst_22 = arith.constant dense<0.000000e+00> : vector<4x8x8xf32>
    %27 = tpu.matmul %25, %26, %cst_22 {dimension_numbers = #tpu.dot_dimension_numbers<[2], [2], [1], [1], [0, 0, 0, 1, 1, 1], [0], [0]>} : vector<4x8x8xbf16>, vector<4x8x8xbf16>, vector<4x8x8xf32> -> vector<4x8x8xf32>
    %cst_23 = arith.constant 0xFF800000 : f32
    "tpu.trace_stop"() : () -> ()
    %28 = vector.shape_cast %24 : vector<1x8x8xi1> to vector<1x8x8xi1>
    %29 = vector.broadcast %28 : vector<1x8x8xi1> to vector<4x8x8xi1>
    %30 = vector.broadcast %cst_23 : f32 to vector<4x8x8xf32>
    %31 = arith.select %29, %27, %30 : vector<4x8x8xi1>, vector<4x8x8xf32>
    %cst_24 = arith.constant dense<0xFF800000> : vector<4x8xf32>
    %32 = vector.multi_reduction <maximumf>, %31, %cst_24 [2] : vector<4x8x8xf32> to vector<4x8xf32>
    %33 = vector.shape_cast %32 : vector<4x8xf32> to vector<4x8x1xf32>
    %34 = vector.broadcast %33 : vector<4x8x1xf32> to vector<4x8x8xf32>
    %35 = arith.subf %31, %34 : vector<4x8x8xf32>
    %36 = math.exp %35 : vector<4x8x8xf32>
    %cst_25 = arith.constant dense<0.000000e+00> : vector<4x8xf32>
    %37 = vector.multi_reduction <add>, %36, %cst_25 [2] : vector<4x8x8xf32> to vector<4x8xf32>
    %38 = vector.shape_cast %37 : vector<4x8xf32> to vector<4x8x1xf32>
    %39 = tpu.reciprocal %38 {approx = true} : vector<4x8x1xf32> -> vector<4x8x1xf32>
    %40 = vector.broadcast %39 : vector<4x8x1xf32> to vector<4x8x8xf32>
    %41 = arith.mulf %36, %40 : vector<4x8x8xf32>
    %c0_26 = arith.constant 0 : index
    %c0_27 = arith.constant 0 : index
    %c0_28 = arith.constant 0 : index
    %c0_29 = arith.constant 0 : index
    %42 = vector.load %arg19[%c0_26, %c0_27, %c0_28, %c0_29] : memref<1x4x8x8xf32, #tpu.memory_space<vmem>>, vector<1x4x8x8xf32>
    %43 = vector.shape_cast %42 : vector<1x4x8x8xf32> to vector<4x8x8xf32>
    %44 = vector.shape_cast %41 : vector<4x8x8xf32> to vector<1x4x8x8xf32>
    tpu.vector_store %arg19[%c0_26, %c0_27, %c0_28, %c0_29], %44 {strides = array<i32>} : memref<1x4x8x8xf32, #tpu.memory_space<vmem>>, vector<1x4x8x8xf32>,
    %45 = arith.truncf %41 : vector<4x8x8xf32> to vector<4x8x8xbf16>
    %46 = arith.truncf %20 : vector<4x8x8xf32> to vector<4x8x8xbf16>
    "tpu.trace_start"() <{level = 10 : i32, message = "hqk,hkd->hqd"}> : () -> ()
    %cst_30 = arith.constant dense<0.000000e+00> : vector<4x8x8xf32>
    %47 = tpu.matmul %45, %46, %cst_30 {dimension_numbers = #tpu.dot_dimension_numbers<[2], [1], [1], [2], [0, 0, 0, 1, 1, 2], [0], [0]>} : vector<4x8x8xbf16>, vector<4x8x8xbf16>, vector<4x8x8xf32> -> vector<4x8x8xf32>
    "tpu.trace_stop"() : () -> ()
    %48 = vector.extract_strided_slice %47 {offsets = [0, 0, 0], sizes = [1, 8, 8], strides = [1, 1, 1]} : vector<4x8x8xf32> to vector<1x8x8xf32>
    %49 = vector.shape_cast %48 : vector<1x8x8xf32> to vector<8x8xf32>
    %c0_31 = arith.constant 0 : index
    %c0_32 = arith.constant 0 : index
    %50 = vector.load %arg20[%c0_31, %c0_32] : memref<8x32xf32, #tpu.memory_space<vmem>>, vector<8x8xf32>
    tpu.vector_store %arg20[%c0_31, %c0_32], %49 {strides = array<i32>} : memref<8x32xf32, #tpu.memory_space<vmem>>, vector<8x8xf32>,
    %51 = vector.extract_strided_slice %47 {offsets = [1, 0, 0], sizes = [1, 8, 8], strides = [1, 1, 1]} : vector<4x8x8xf32> to vector<1x8x8xf32>
    %52 = vector.shape_cast %51 : vector<1x8x8xf32> to vector<8x8xf32>
    %c0_33 = arith.constant 0 : index
    %c8 = arith.constant 8 : index
    %53 = vector.load %arg20[%c0_33, %c8] : memref<8x32xf32, #tpu.memory_space<vmem>>, vector<8x8xf32>
    tpu.vector_store %arg20[%c0_33, %c8], %52 {strides = array<i32>} : memref<8x32xf32, #tpu.memory_space<vmem>>, vector<8x8xf32>,
    %54 = vector.extract_strided_slice %47 {offsets = [2, 0, 0], sizes = [1, 8, 8], strides = [1, 1, 1]} : vector<4x8x8xf32> to vector<1x8x8xf32>
    %55 = vector.shape_cast %54 : vector<1x8x8xf32> to vector<8x8xf32>
    %c0_34 = arith.constant 0 : index
    %c16 = arith.constant 16 : index
    %56 = vector.load %arg20[%c0_34, %c16] : memref<8x32xf32, #tpu.memory_space<vmem>>, vector<8x8xf32>
    tpu.vector_store %arg20[%c0_34, %c16], %55 {strides = array<i32>} : memref<8x32xf32, #tpu.memory_space<vmem>>, vector<8x8xf32>,
    %57 = vector.extract_strided_slice %47 {offsets = [3, 0, 0], sizes = [1, 8, 8], strides = [1, 1, 1]} : vector<4x8x8xf32> to vector<1x8x8xf32>
    %58 = vector.shape_cast %57 : vector<1x8x8xf32> to vector<8x8xf32>
    %c0_35 = arith.constant 0 : index
    %c24 = arith.constant 24 : index
    %59 = vector.load %arg20[%c0_35, %c24] : memref<8x32xf32, #tpu.memory_space<vmem>>, vector<8x8xf32>
    tpu.vector_store %arg20[%c0_35, %c24], %58 {strides = array<i32>} : memref<8x32xf32, #tpu.memory_space<vmem>>, vector<8x8xf32>,
    %c0_36 = arith.constant 0 : index
    %c0_37 = arith.constant 0 : index
    %60 = vector.load %arg20[%c0_36, %c0_37] : memref<8x32xf32, #tpu.memory_space<vmem>>, vector<8x32xf32>
    %61 = arith.truncf %60 : vector<8x32xf32> to vector<8x32xbf16>
    %c0_38 = arith.constant 0 : index
    %c0_39 = arith.constant 0 : index
    %62 = vector.load %arg8[%c0_38, %c0_39] : memref<32x32xbf16, #tpu.memory_space<vmem>>, vector<32x32xbf16>
    %cst_40 = arith.constant dense<0.000000e+00> : vector<8x32xf32>
    %63 = tpu.matmul %61, %62, %cst_40 {dimension_numbers = #tpu.dot_dimension_numbers<[1], [0], [0], [1], [0, 0, 1, 1], [], []>} : vector<8x32xbf16>, vector<32x32xbf16>, vector<8x32xf32> -> vector<8x32xf32>
    %c0_41 = arith.constant 0 : index
    %c0_42 = arith.constant 0 : index
    %64 = vector.load %arg9[%c0_41, %c0_42] : memref<1x32xf32, #tpu.memory_space<vmem>>, vector<1x32xf32>
    %65 = vector.broadcast %64 : vector<1x32xf32> to vector<8x32xf32>
    %66 = arith.addf %63, %65 : vector<8x32xf32>
    %c0_43 = arith.constant 0 : index
    %c0_44 = arith.constant 0 : index
    %67 = vector.load %arg10[%c0_43, %c0_44] : memref<1x32xf32, #tpu.memory_space<vmem>>, vector<1x32xf32>
    %c0_45 = arith.constant 0 : index
    %c0_46 = arith.constant 0 : index
    %68 = vector.load %arg11[%c0_45, %c0_46] : memref<1x32xf32, #tpu.memory_space<vmem>>, vector<1x32xf32>
    %69 = arith.addf %66, %1 : vector<8x32xf32>
    %cst_47 = arith.constant dense<0.000000e+00> : vector<8xf32>
    %70 = vector.multi_reduction <add>, %69, %cst_47 [1] : vector<8x32xf32> to vector<8xf32>
    %71 = vector.shape_cast %70 : vector<8xf32> to vector<8x1xf32>
    %cst_48 = arith.constant 3.200000e+01 : f32
    %72 = vector.broadcast %cst_48 : f32 to vector<8x1xf32>
    %73 = arith.divf %71, %72 : vector<8x1xf32>
    %74 = vector.broadcast %73 : vector<8x1xf32> to vector<8x32xf32>
    %75 = arith.subf %69, %74 : vector<8x32xf32>
    %76 = arith.mulf %75, %75 : vector<8x32xf32>
    %cst_49 = arith.constant dense<0.000000e+00> : vector<8xf32>
    %77 = vector.multi_reduction <add>, %76, %cst_49 [1] : vector<8x32xf32> to vector<8xf32>
    %78 = vector.shape_cast %77 : vector<8xf32> to vector<8x1xf32>
    %cst_50 = arith.constant 3.200000e+01 : f32
    %79 = vector.broadcast %cst_50 : f32 to vector<8x1xf32>
    %80 = arith.divf %78, %79 : vector<8x1xf32>
    %cst_51 = arith.constant 9.99999974E-6 : f32
    %81 = vector.broadcast %cst_51 : f32 to vector<8x1xf32>
    %82 = arith.addf %80, %81 : vector<8x1xf32>
    %83 = math.rsqrt %82 : vector<8x1xf32>
    %84 = vector.broadcast %83 : vector<8x1xf32> to vector<8x32xf32>
    %85 = arith.mulf %75, %84 : vector<8x32xf32>
    %86 = vector.broadcast %67 : vector<1x32xf32> to vector<8x32xf32>
    %87 = arith.mulf %85, %86 : vector<8x32xf32>
    %88 = vector.broadcast %68 : vector<1x32xf32> to vector<8x32xf32>
    %89 = arith.addf %87, %88 : vector<8x32xf32>
    %90 = arith.truncf %89 : vector<8x32xf32> to vector<8x32xbf16>
    %c0_52 = arith.constant 0 : index
    %c0_53 = arith.constant 0 : index
    %91 = vector.load %arg12[%c0_52, %c0_53] : memref<32x4xbf16, #tpu.memory_space<vmem>>, vector<32x4xbf16>
    %cst_54 = arith.constant dense<0.000000e+00> : vector<8x4xf32>
    %92 = tpu.matmul %90, %91, %cst_54 {dimension_numbers = #tpu.dot_dimension_numbers<[1], [0], [0], [1], [0, 0, 1, 1], [], []>} : vector<8x32xbf16>, vector<32x4xbf16>, vector<8x4xf32> -> vector<8x4xf32>
    %c0_55 = arith.constant 0 : index
    %c0_56 = arith.constant 0 : index
    %93 = vector.load %arg13[%c0_55, %c0_56] : memref<1x4xf32, #tpu.memory_space<vmem>>, vector<1x4xf32>
    %94 = vector.broadcast %93 : vector<1x4xf32> to vector<8x4xf32>
    %95 = arith.addf %92, %94 : vector<8x4xf32>
    %cst_57 = arith.constant dense<0xFF800000> : vector<8xf32>
    %96 = vector.multi_reduction <maximumf>, %95, %cst_57 [1] : vector<8x4xf32> to vector<8xf32>
    %97 = vector.shape_cast %96 : vector<8xf32> to vector<8x1xf32>
    %98 = vector.broadcast %97 : vector<8x1xf32> to vector<8x4xf32>
    %99 = arith.subf %95, %98 : vector<8x4xf32>
    %100 = math.exp %99 : vector<8x4xf32>
    %cst_58 = arith.constant dense<0.000000e+00> : vector<8xf32>
    %101 = vector.multi_reduction <add>, %100, %cst_58 [1] : vector<8x4xf32> to vector<8xf32>
    %102 = vector.shape_cast %101 : vector<8xf32> to vector<8x1xf32>
    %103 = tpu.reciprocal %102 {approx = true} : vector<8x1xf32> -> vector<8x1xf32>
    %104 = vector.broadcast %103 : vector<8x1xf32> to vector<8x4xf32>
    %105 = arith.mulf %100, %104 : vector<8x4xf32>
    %cst_59 = arith.constant dense<0xFF800000> : vector<8xf32>
    %106 = vector.multi_reduction <maximumf>, %105, %cst_59 [1] : vector<8x4xf32> to vector<8xf32>
    %107 = vector.shape_cast %106 : vector<8xf32> to vector<8x1xf32>
    %108 = vector.broadcast %107 : vector<8x1xf32> to vector<8x4xf32>
    %109 = arith.cmpf oge, %105, %108 : vector<8x4xf32>
    %cst_60 = arith.constant 0xFF800000 : f32
    %110 = vector.broadcast %cst_60 : f32 to vector<8x4xf32>
    %111 = arith.select %109, %110, %105 : vector<8x4xi1>, vector<8x4xf32>
    %cst_61 = arith.constant dense<0xFF800000> : vector<8xf32>
    %112 = vector.multi_reduction <maximumf>, %111, %cst_61 [1] : vector<8x4xf32> to vector<8xf32>
    %113 = vector.shape_cast %112 : vector<8xf32> to vector<8x1xf32>
    %114 = vector.broadcast %113 : vector<8x1xf32> to vector<8x4xf32>
    %115 = arith.cmpf oge, %105, %114 : vector<8x4xf32>
    %cst_62 = arith.constant 0xFF800000 : f32
    %116 = vector.broadcast %cst_62 : f32 to vector<8x4xf32>
    %117 = arith.select %115, %105, %116 : vector<8x4xi1>, vector<8x4xf32>
    %cst_63 = arith.constant dense<0xFF800000> : vector<8xf32>
    %118 = vector.multi_reduction <maximumf>, %117, %cst_63 [1] : vector<8x4xf32> to vector<8xf32>
    %119 = vector.shape_cast %118 : vector<8xf32> to vector<8x1xf32>
    %120 = vector.broadcast %119 : vector<8x1xf32> to vector<8x4xf32>
    %121 = arith.subf %117, %120 : vector<8x4xf32>
    %122 = math.exp %121 : vector<8x4xf32>
    %cst_64 = arith.constant dense<0.000000e+00> : vector<8xf32>
    %123 = vector.multi_reduction <add>, %122, %cst_64 [1] : vector<8x4xf32> to vector<8xf32>
    %124 = vector.shape_cast %123 : vector<8xf32> to vector<8x1xf32>
    %125 = tpu.reciprocal %124 {approx = true} : vector<8x1xf32> -> vector<8x1xf32>
    %126 = vector.broadcast %125 : vector<8x1xf32> to vector<8x4xf32>
    %127 = arith.mulf %122, %126 : vector<8x4xf32>
    %c0_65 = arith.constant 0 : index
    %c0_66 = arith.constant 0 : index
    %128 = vector.load %arg14[%c0_65, %c0_66] : memref<32x512xbf16, #tpu.memory_space<vmem>>, vector<32x512xbf16>
    %cst_67 = arith.constant dense<0.000000e+00> : vector<8x512xf32>
    %129 = tpu.matmul %90, %128, %cst_67 {dimension_numbers = #tpu.dot_dimension_numbers<[1], [0], [0], [1], [0, 0, 1, 1], [], []>} : vector<8x32xbf16>, vector<32x512xbf16>, vector<8x512xf32> -> vector<8x512xf32>
    %c0_68 = arith.constant 0 : index
    %c0_69 = arith.constant 0 : index
    %130 = vector.load %arg15[%c0_68, %c0_69] : memref<1x512xf32, #tpu.memory_space<vmem>>, vector<1x512xf32>
    %131 = vector.broadcast %130 : vector<1x512xf32> to vector<8x512xf32>
    %132 = arith.addf %129, %131 : vector<8x512xf32>
    %cst_70 = arith.constant 5.000000e-01 : f32
    %133 = vector.broadcast %cst_70 : f32 to vector<8x512xf32>
    %134 = arith.mulf %133, %132 : vector<8x512xf32>
    %cst_71 = arith.constant 4.471500e-02 : f32
    %135 = vector.broadcast %cst_71 : f32 to vector<8x512xf32>
    %136 = arith.mulf %135, %132 : vector<8x512xf32>
    %137 = arith.mulf %136, %132 : vector<8x512xf32>
    %138 = arith.mulf %137, %132 : vector<8x512xf32>
    %139 = arith.addf %132, %138 : vector<8x512xf32>
    %cst_72 = arith.constant 0.797884583 : f32
    %140 = vector.broadcast %cst_72 : f32 to vector<8x512xf32>
    %141 = arith.mulf %140, %139 : vector<8x512xf32>
    %142 = math.tanh %141 : vector<8x512xf32>
    %cst_73 = arith.constant 1.000000e+00 : f32
    %143 = vector.broadcast %cst_73 : f32 to vector<8x512xf32>
    %144 = arith.addf %143, %142 : vector<8x512xf32>
    %145 = arith.mulf %134, %144 : vector<8x512xf32>
    %146 = arith.truncf %145 : vector<8x512xf32> to vector<8x512xbf16>
    %cst_74 = arith.constant 0.000000e+00 : f32
    %147 = vector.broadcast %cst_74 : f32 to vector<8x32xf32>
    %148 = vector.extract_strided_slice %146 {offsets = [0, 0], sizes = [8, 128], strides = [1, 1]} : vector<8x512xbf16> to vector<8x128xbf16>
    %c0_75 = arith.constant 0 : index
    %c0_76 = arith.constant 0 : index
    %c0_77 = arith.constant 0 : index
    %149 = vector.load %arg16[%c0_75, %c0_76, %c0_77] : memref<4x128x32xbf16, #tpu.memory_space<vmem>>, vector<1x128x32xbf16>
    %150 = vector.shape_cast %149 : vector<1x128x32xbf16> to vector<128x32xbf16>
    %cst_78 = arith.constant dense<0.000000e+00> : vector<8x32xf32>
    %151 = tpu.matmul %148, %150, %cst_78 {dimension_numbers = #tpu.dot_dimension_numbers<[1], [0], [0], [1], [0, 0, 1, 1], [], []>} : vector<8x128xbf16>, vector<128x32xbf16>, vector<8x32xf32> -> vector<8x32xf32>
    %c0_79 = arith.constant 0 : index
    %c0_80 = arith.constant 0 : index
    %c0_81 = arith.constant 0 : index
    %152 = vector.load %arg17[%c0_79, %c0_80, %c0_81] : memref<4x1x32xf32, #tpu.memory_space<vmem>>, vector<1x1x32xf32>
    %153 = vector.shape_cast %152 : vector<1x1x32xf32> to vector<1x32xf32>
    %154 = vector.broadcast %153 : vector<1x32xf32> to vector<8x32xf32>
    %155 = arith.addf %151, %154 : vector<8x32xf32>
    %156 = vector.extract_strided_slice %127 {offsets = [0, 0], sizes = [8, 1], strides = [1, 1]} : vector<8x4xf32> to vector<8x1xf32>
    %157 = vector.broadcast %156 : vector<8x1xf32> to vector<8x32xf32>
    %158 = arith.mulf %157, %155 : vector<8x32xf32>
    %159 = arith.addf %147, %158 : vector<8x32xf32>
    %160 = vector.extract_strided_slice %146 {offsets = [0, 128], sizes = [8, 128], strides = [1, 1]} : vector<8x512xbf16> to vector<8x128xbf16>
    %c1 = arith.constant 1 : index
    %c0_82 = arith.constant 0 : index
    %c0_83 = arith.constant 0 : index
    %161 = vector.load %arg16[%c1, %c0_82, %c0_83] : memref<4x128x32xbf16, #tpu.memory_space<vmem>>, vector<1x128x32xbf16>
    %162 = vector.shape_cast %161 : vector<1x128x32xbf16> to vector<128x32xbf16>
    %cst_84 = arith.constant dense<0.000000e+00> : vector<8x32xf32>
    %163 = tpu.matmul %160, %162, %cst_84 {dimension_numbers = #tpu.dot_dimension_numbers<[1], [0], [0], [1], [0, 0, 1, 1], [], []>} : vector<8x128xbf16>, vector<128x32xbf16>, vector<8x32xf32> -> vector<8x32xf32>
    %c1_85 = arith.constant 1 : index
    %c0_86 = arith.constant 0 : index
    %c0_87 = arith.constant 0 : index
    %164 = vector.load %arg17[%c1_85, %c0_86, %c0_87] : memref<4x1x32xf32, #tpu.memory_space<vmem>>, vector<1x1x32xf32>
    %165 = vector.shape_cast %164 : vector<1x1x32xf32> to vector<1x32xf32>
    %166 = vector.broadcast %165 : vector<1x32xf32> to vector<8x32xf32>
    %167 = arith.addf %163, %166 : vector<8x32xf32>
    %168 = vector.extract_strided_slice %127 {offsets = [0, 1], sizes = [8, 1], strides = [1, 1]} : vector<8x4xf32> to vector<8x1xf32>
    %169 = vector.broadcast %168 : vector<8x1xf32> to vector<8x32xf32>
    %170 = arith.mulf %169, %167 : vector<8x32xf32>
    %171 = arith.addf %159, %170 : vector<8x32xf32>
    %172 = vector.extract_strided_slice %146 {offsets = [0, 256], sizes = [8, 128], strides = [1, 1]} : vector<8x512xbf16> to vector<8x128xbf16>
    %c2 = arith.constant 2 : index
    %c0_88 = arith.constant 0 : index
    %c0_89 = arith.constant 0 : index
    %173 = vector.load %arg16[%c2, %c0_88, %c0_89] : memref<4x128x32xbf16, #tpu.memory_space<vmem>>, vector<1x128x32xbf16>
    %174 = vector.shape_cast %173 : vector<1x128x32xbf16> to vector<128x32xbf16>
    %cst_90 = arith.constant dense<0.000000e+00> : vector<8x32xf32>
    %175 = tpu.matmul %172, %174, %cst_90 {dimension_numbers = #tpu.dot_dimension_numbers<[1], [0], [0], [1], [0, 0, 1, 1], [], []>} : vector<8x128xbf16>, vector<128x32xbf16>, vector<8x32xf32> -> vector<8x32xf32>
    %c2_91 = arith.constant 2 : index
    %c0_92 = arith.constant 0 : index
    %c0_93 = arith.constant 0 : index
    %176 = vector.load %arg17[%c2_91, %c0_92, %c0_93] : memref<4x1x32xf32, #tpu.memory_space<vmem>>, vector<1x1x32xf32>
    %177 = vector.shape_cast %176 : vector<1x1x32xf32> to vector<1x32xf32>
    %178 = vector.broadcast %177 : vector<1x32xf32> to vector<8x32xf32>
    %179 = arith.addf %175, %178 : vector<8x32xf32>
    %180 = vector.extract_strided_slice %127 {offsets = [0, 2], sizes = [8, 1], strides = [1, 1]} : vector<8x4xf32> to vector<8x1xf32>
    %181 = vector.broadcast %180 : vector<8x1xf32> to vector<8x32xf32>
    %182 = arith.mulf %181, %179 : vector<8x32xf32>
    %183 = arith.addf %171, %182 : vector<8x32xf32>
    %184 = vector.extract_strided_slice %146 {offsets = [0, 384], sizes = [8, 128], strides = [1, 1]} : vector<8x512xbf16> to vector<8x128xbf16>
    %c3 = arith.constant 3 : index
    %c0_94 = arith.constant 0 : index
    %c0_95 = arith.constant 0 : index
    %185 = vector.load %arg16[%c3, %c0_94, %c0_95] : memref<4x128x32xbf16, #tpu.memory_space<vmem>>, vector<1x128x32xbf16>
    %186 = vector.shape_cast %185 : vector<1x128x32xbf16> to vector<128x32xbf16>
    %cst_96 = arith.constant dense<0.000000e+00> : vector<8x32xf32>
    %187 = tpu.matmul %184, %186, %cst_96 {dimension_numbers = #tpu.dot_dimension_numbers<[1], [0], [0], [1], [0, 0, 1, 1], [], []>} : vector<8x128xbf16>, vector<128x32xbf16>, vector<8x32xf32> -> vector<8x32xf32>
    %c3_97 = arith.constant 3 : index
    %c0_98 = arith.constant 0 : index
    %c0_99 = arith.constant 0 : index
    %188 = vector.load %arg17[%c3_97, %c0_98, %c0_99] : memref<4x1x32xf32, #tpu.memory_space<vmem>>, vector<1x1x32xf32>
    %189 = vector.shape_cast %188 : vector<1x1x32xf32> to vector<1x32xf32>
    %190 = vector.broadcast %189 : vector<1x32xf32> to vector<8x32xf32>
    %191 = arith.addf %187, %190 : vector<8x32xf32>
    %192 = vector.extract_strided_slice %127 {offsets = [0, 3], sizes = [8, 1], strides = [1, 1]} : vector<8x4xf32> to vector<8x1xf32>
    %193 = vector.broadcast %192 : vector<8x1xf32> to vector<8x32xf32>
    %194 = arith.mulf %193, %191 : vector<8x32xf32>
    %195 = arith.addf %183, %194 : vector<8x32xf32>
    %196 = arith.addf %195, %89 : vector<8x32xf32>
    %cst_100 = arith.constant dense<0.000000e+00> : vector<8xf32>
    %197 = vector.multi_reduction <add>, %196, %cst_100 [1] : vector<8x32xf32> to vector<8xf32>
    %198 = vector.shape_cast %197 : vector<8xf32> to vector<8x1xf32>
    %cst_101 = arith.constant 3.200000e+01 : f32
    %199 = vector.broadcast %cst_101 : f32 to vector<8x1xf32>
    %200 = arith.divf %198, %199 : vector<8x1xf32>
    %201 = vector.broadcast %200 : vector<8x1xf32> to vector<8x32xf32>
    %202 = arith.subf %196, %201 : vector<8x32xf32>
    %203 = arith.mulf %202, %202 : vector<8x32xf32>
    %cst_102 = arith.constant dense<0.000000e+00> : vector<8xf32>
    %204 = vector.multi_reduction <add>, %203, %cst_102 [1] : vector<8x32xf32> to vector<8xf32>
    %205 = vector.shape_cast %204 : vector<8xf32> to vector<8x1xf32>
    %cst_103 = arith.constant 3.200000e+01 : f32
    %206 = vector.broadcast %cst_103 : f32 to vector<8x1xf32>
    %207 = arith.divf %205, %206 : vector<8x1xf32>
    %cst_104 = arith.constant 9.99999974E-6 : f32
    %208 = vector.broadcast %cst_104 : f32 to vector<8x1xf32>
    %209 = arith.addf %207, %208 : vector<8x1xf32>
    %210 = math.rsqrt %209 : vector<8x1xf32>
    %211 = vector.broadcast %210 : vector<8x1xf32> to vector<8x32xf32>
    %212 = arith.mulf %202, %211 : vector<8x32xf32>
    %213 = vector.broadcast %67 : vector<1x32xf32> to vector<8x32xf32>
    %214 = arith.mulf %212, %213 : vector<8x32xf32>
    %215 = vector.broadcast %68 : vector<1x32xf32> to vector<8x32xf32>
    %216 = arith.addf %214, %215 : vector<8x32xf32>
    %c0_105 = arith.constant 0 : index
    %c0_106 = arith.constant 0 : index
    %c0_107 = arith.constant 0 : index
    %217 = vector.load %arg18[%c0_105, %c0_106, %c0_107] : memref<1x8x32xf32, #tpu.memory_space<vmem>>, vector<1x8x32xf32>
    %218 = vector.shape_cast %217 : vector<1x8x32xf32> to vector<8x32xf32>
    %219 = vector.shape_cast %216 : vector<8x32xf32> to vector<1x8x32xf32>
    tpu.vector_store %arg18[%c0_105, %c0_106, %c0_107], %219 {strides = array<i32>} : memref<1x8x32xf32, #tpu.memory_space<vmem>>, vector<1x8x32xf32>,
    return
  }
  func.func @transform_0(%arg0: i32) -> (i32, i32, i32) {
    %c0_i32 = arith.constant 0 : i32
    %c0_i32_0 = arith.constant 0 : i32
    %c0_i32_1 = arith.constant 0 : i32
    return %arg0, %c0_i32, %c0_i32_0 : i32, i32, i32
  }
  func.func @transform_1(%arg0: i32) -> (i32, i32, i32) {
    %c0_i32 = arith.constant 0 : i32
    %c0_i32_0 = arith.constant 0 : i32
    %c0_i32_1 = arith.constant 0 : i32
    %c0_i32_2 = arith.constant 0 : i32
    return %c0_i32, %c0_i32_0, %c0_i32_1 : i32, i32, i32
  }
  func.func @transform_2(%arg0: i32) -> (i32, i32, i32) {
    %c0_i32 = arith.constant 0 : i32
    %c0_i32_0 = arith.constant 0 : i32
    %c0_i32_1 = arith.constant 0 : i32
    %c0_i32_2 = arith.constant 0 : i32
    return %c0_i32, %c0_i32_0, %c0_i32_1 : i32, i32, i32
  }
  func.func @transform_3(%arg0: i32) -> (i32, i32, i32) {
    %c0_i32 = arith.constant 0 : i32
    %c0_i32_0 = arith.constant 0 : i32
    %c0_i32_1 = arith.constant 0 : i32
    %c0_i32_2 = arith.constant 0 : i32
    return %c0_i32, %c0_i32_0, %c0_i32_1 : i32, i32, i32
  }
  func.func @transform_4(%arg0: i32) -> (i32, i32, i32) {
    %c0_i32 = arith.constant 0 : i32
    %c0_i32_0 = arith.constant 0 : i32
    %c0_i32_1 = arith.constant 0 : i32
    %c0_i32_2 = arith.constant 0 : i32
    return %c0_i32, %c0_i32_0, %c0_i32_1 : i32, i32, i32
  }
  func.func @transform_5(%arg0: i32) -> (i32, i32, i32) {
    %c0_i32 = arith.constant 0 : i32
    %c0_i32_0 = arith.constant 0 : i32
    %c0_i32_1 = arith.constant 0 : i32
    %c0_i32_2 = arith.constant 0 : i32
    return %c0_i32, %c0_i32_0, %c0_i32_1 : i32, i32, i32
  }
  func.func @transform_6(%arg0: i32) -> (i32, i32, i32) {
    %c0_i32 = arith.constant 0 : i32
    %c0_i32_0 = arith.constant 0 : i32
    %c0_i32_1 = arith.constant 0 : i32
    %c0_i32_2 = arith.constant 0 : i32
    return %c0_i32, %c0_i32_0, %c0_i32_1 : i32, i32, i32
  }
  func.func @transform_7(%arg0: i32) -> (i32, i32) {
    %c0_i32 = arith.constant 0 : i32
    %c0_i32_0 = arith.constant 0 : i32
    %c0_i32_1 = arith.constant 0 : i32
    return %c0_i32, %c0_i32_0 : i32, i32
  }
  func.func @transform_8(%arg0: i32) -> (i32, i32) {
    %c0_i32 = arith.constant 0 : i32
    %c0_i32_0 = arith.constant 0 : i32
    %c0_i32_1 = arith.constant 0 : i32
    return %c0_i32, %c0_i32_0 : i32, i32
  }
  func.func @transform_9(%arg0: i32) -> (i32, i32) {
    %c0_i32 = arith.constant 0 : i32
    %c0_i32_0 = arith.constant 0 : i32
    %c0_i32_1 = arith.constant 0 : i32
    return %c0_i32, %c0_i32_0 : i32, i32
  }
  func.func @transform_10(%arg0: i32) -> (i32, i32) {
    %c0_i32 = arith.constant 0 : i32
    %c0_i32_0 = arith.constant 0 : i32
    %c0_i32_1 = arith.constant 0 : i32
    return %c0_i32, %c0_i32_0 : i32, i32
  }
  func.func @transform_11(%arg0: i32) -> (i32, i32) {
    %c0_i32 = arith.constant 0 : i32
    %c0_i32_0 = arith.constant 0 : i32
    %c0_i32_1 = arith.constant 0 : i32
    return %c0_i32, %c0_i32_0 : i32, i32
  }
  func.func @transform_12(%arg0: i32) -> (i32, i32) {
    %c0_i32 = arith.constant 0 : i32
    %c0_i32_0 = arith.constant 0 : i32
    %c0_i32_1 = arith.constant 0 : i32
    return %c0_i32, %c0_i32_0 : i32, i32
  }
  func.func @transform_13(%arg0: i32) -> (i32, i32) {
    %c0_i32 = arith.constant 0 : i32
    %c0_i32_0 = arith.constant 0 : i32
    %c0_i32_1 = arith.constant 0 : i32
    return %c0_i32, %c0_i32_0 : i32, i32
  }
  func.func @transform_14(%arg0: i32) -> (i32, i32) {
    %c0_i32 = arith.constant 0 : i32
    %c0_i32_0 = arith.constant 0 : i32
    %c0_i32_1 = arith.constant 0 : i32
    return %c0_i32, %c0_i32_0 : i32, i32
  }
  func.func @transform_15(%arg0: i32) -> (i32, i32, i32) {
    %c0_i32 = arith.constant 0 : i32
    %c0_i32_0 = arith.constant 0 : i32
    %c0_i32_1 = arith.constant 0 : i32
    %c0_i32_2 = arith.constant 0 : i32
    return %c0_i32, %c0_i32_0, %c0_i32_1 : i32, i32, i32
  }
  func.func @transform_16(%arg0: i32) -> (i32, i32, i32) {
    %c0_i32 = arith.constant 0 : i32
    %c0_i32_0 = arith.constant 0 : i32
    %c0_i32_1 = arith.constant 0 : i32
    %c0_i32_2 = arith.constant 0 : i32
    return %c0_i32, %c0_i32_0, %c0_i32_1 : i32, i32, i32
  }
  func.func @transform_17(%arg0: i32) -> (i32, i32, i32) {
    %c0_i32 = arith.constant 0 : i32
    %c0_i32_0 = arith.constant 0 : i32
    %c0_i32_1 = arith.constant 0 : i32
    return %arg0, %c0_i32, %c0_i32_0 : i32, i32, i32
  }
  func.func @transform_18(%arg0: i32) -> (i32, i32, i32, i32) {
    %c0_i32 = arith.constant 0 : i32
    %c0_i32_0 = arith.constant 0 : i32
    %c0_i32_1 = arith.constant 0 : i32
    %c0_i32_2 = arith.constant 0 : i32
    return %arg0, %c0_i32, %c0_i32_0, %c0_i32_1 : i32, i32, i32, i32
  }
}

</mosaic_0001>

<bundles_post_ra>
// kernel: tpu_custom_call.1
= control target key start
LH: loop header
LB: loop body
LE: loop exit
PB: predicated region body
PF: predicated region fallthrough
CT: control target
= control target key end

     0   :  { %s5660_s0 = inlined_call_operand.hbm [shape: f32[2,8,32], index: 0, kind: input, shape index: {}]   ;;  %s5661_s1 = inlined_call_operand.hbm [shape: bf16[4,32,8], index: 1, kind: input, shape index: {}]   ;;  %s5662_s2 = inlined_call_operand.hbm [shape: f32[4,1,8], index: 2, kind: input, shape index: {}]   ;;  %s5663_s3 = inlined_call_operand.hbm [shape: bf16[4,32,8], index: 3, kind: input, shape index: {}]   ;;  %s5664_s4 = inlined_call_operand.hbm [shape: f32[4,1,8], index: 4, kind: input, shape index: {}]   ;;  %s5665_s5 = inlined_call_operand.hbm [shape: bf16[4,32,8], index: 5, kind: input, shape index: {}]   ;;  %s5666_s6 = inlined_call_operand.hbm [shape: f32[4,1,8], index: 6, kind: input, shape index: {}]   ;;  %s5667_s7 = inlined_call_operand.hbm [shape: bf16[32,32], index: 7, kind: input, shape index: {}]   ;;  %s5668_s8 = inlined_call_operand.hbm [shape: f32[1,32], index: 8, kind: input, shape index: {}]   ;;  %s5669_s9 = inlined_call_operand.hbm [shape: f32[1,32], index: 9, kind: input, shape index: {}]   ;;  %s5670_s10 = inlined_call_operand.hbm [shape: f32[1,32], index: 10, kind: input, shape index: {}]   ;;  %s5671_s11 = inlined_call_operand.hbm [shape: bf16[32,4], index: 11, kind: input, shape index: {}]   ;;  %s5672_s12 = inlined_call_operand.hbm [shape: f32[1,4], index: 12, kind: input, shape index: {}]   ;;  %s5673_s13 = inlined_call_operand.hbm [shape: bf16[32,512], index: 13, kind: input, shape index: {}]   ;;  %s5674_s14 = inlined_call_operand.hbm [shape: f32[1,512], index: 14, kind: input, shape index: {}]   ;;  %s5675_s15 = inlined_call_operand.hbm [shape: bf16[4,128,32], index: 15, kind: input, shape index: {}]   ;;  %s5676_s16 = inlined_call_operand.hbm [shape: f32[4,1,32], index: 16, kind: input, shape index: {}]   ;;  %s5677_s17 = inlined_call_operand.hbm [shape: f32[2,8,32], index: 17, kind: output, shape index: {0}]   ;;  %s5678_s18 = inlined_call_operand.hbm [shape: f32[2,4,8,8], index: 18, kind: output, shape index: {1}]  }
   0x1   :  { %5701 = sst [smem:[#allocation50_spill]] %s5660_s0 }
   0x2   :  { %5702 = sst [smem:[#allocation51_spill]] %s5661_s1 }
   0x3   :  { %5703 = sst [smem:[#allocation52_spill]] %s5662_s2 }
   0x4   :  { %5704 = sst [smem:[#allocation53_spill]] %s5663_s3 }
   0x5   :  { %5705 = sst [smem:[#allocation54_spill]] %s5664_s4 }
   0x6   :  { %5706 = sst [smem:[#allocation55_spill]] %s5665_s5 }
   0x7   :  { %5707 = sst [smem:[#allocation56_spill]] %s5666_s6 }
   0x8   :  { %5708 = sst [smem:[#allocation57_spill]] %s5677_s17 }
   0x9   :  { %5709 = sst [smem:[#allocation58_spill]] %s5678_s18 }
   0xa   :  { %24 = vsyncpa [#allocation4], 0 }
   0xb   :  { %26 = vsyncpa [#allocation4 + $0x1], 0 }
   0xc   :  { %27 = vsyncpa [#allocation7], 0 }
   0xd   :  { %28 = vsyncpa [#allocation10], 0 }
   0xe   :  { %29 = vsyncpa [#allocation13], 0 }
   0xf   :  { %30 = vsyncpa [#allocation16], 0 }
  0x10   :  { %31 = vsyncpa [#allocation19], 0 }
  0x11   :  { %32 = vsyncpa [#allocation22], 0 }
  0x12   :  { %33 = vsyncpa [#allocation25], 0 }
  0x13   :  { %34 = vsyncpa [#allocation28], 0 }
  0x14   :  { %35 = vsyncpa [#allocation5], 0 }
  0x15   :  { %37 = vsyncpa [#allocation5 + $0x1], 0 }
  0x16   :  { %38 = vsyncpa [#allocation32], 0 }
  0x17   :  { %40 = vsyncpa [#allocation32 + $0x1], 0  ;;  %s4797_s27 = smov 0   ;;  %s4799_s28 = smov 0  }
  0x18   :  { %s4801_s29 = smov 0   ;;  %s4803_s30 = smov 0  }
  0x19 LB: > { %5710 = sst [smem:[#allocation44_spill]] %s4654_s27  ;;  %s4668_s0 = smov [#allocation6]   ;;  %s4666_s30 = sphi %s4803_s30, %s5206_s30   ;;  %s4662_s29 = sphi %s4801_s29, %s5771_s29   ;;  %s4658_s28 = sphi %s4799_s28, %s5770_s28   ;;  %s4654_s27 = sphi %s4797_s27, %s5769_s27  }
  0x1a   : > { %5711 = sst [smem:[#allocation45_spill]] %s4658_s28  ;;  %s477_s19 = sshll.u32 %s4668_s0, 4  ;;  %s4823_s19 = int_to_ptr.vmem [resolvable:$true] %s477_s19 }
  0x1b   : > { %5712 = sst [smem:[#allocation46_spill]] %s4662_s29  ;;  %s4818_s1 = sadd.s32 4294967295, %s4666_s30  }
  0x1c   : > { %5713 = sst [smem:[#allocation47_spill]] %s4666_s30  ;;  %p3224_p0 = scmp.ge.s32.totalorder %s4666_s30, 1 }
  0x1d   : > { %5714 = sst [smem:[#allocation48_spill]] %s4818_s1  ;;  %p5693_p1 = scmp.eq.s32.totalorder %s4818_s1, 0 }
  0x1e   : > { %p465_p2 = scmp.lt.s32.totalorder %s4666_s30, 3  ;;  %s4669_s21 = smov [#allocation9]  }
  0x1f   : > { %s503_s22 = sshll.u32 %s4669_s21, 4  ;;  %s4670_s23 = smov [#allocation12]   ;;  %s4838_s22 = int_to_ptr.vmem [resolvable:$true] %s503_s22 }
  0x20   : > { %p4825_p3 = pnand %p3224_p0, %p465_p2  ;;  %s529_s24 = sshll.u32 %s4670_s23, 4  ;;  %s4840_s24 = int_to_ptr.vmem [resolvable:$true] %s529_s24 }
  0x21   : > { %s5718_s0 = sld [smem:[#allocation51_spill]] }
  0x22   : > { %s5715_s20 = scalar_select %p4825_p3, 1, 0 }
  0x23   : > { %p3788_p5 = pneg %p4825_p3 }
  0x24   : > { %5716 = sst [smem:[#allocation49_spill]] %s5715_s20 }
  0x25   : > { %p4834_p6 = pnand %p3788_p5, %p5693_p1 }
  0x27   : > { %s4058_s17 = scalar_lea.hbm %s5718_s0, 1024  ;;  %p4850_p8 = pneg %p4834_p6 }
  0x28   : > { %p4059_p7 = scmp.ne.s32.totalorder %s5718_s0, %s4058_s17  ;;  %p4065_p11 = scmp.lt.u32.totalorder %s4058_s17, %s5718_s0 }
  0x2a   : > { %p4061_p9 = pnand %p4850_p8, %p4059_p7 }
  0x2c   : > { %p4062_p10 = pneg %p4061_p9 }
  0x2e   : > { %p4067_p12 = pnand %p4065_p11, %p4062_p10 }
  0x30   : > { %4070 = shalt.err (!%p4067_p12)
}
  0x31   : > { %s4071_s18 = scalar_lea.vmem %s4823_s19, 1024  ;;  %p4079_p5 = scmp.lt.s32.totalorder %s4823_s19, %s4823_s19 }
  0x32   : > { %p4072_p13 = scmp.ne.s32.totalorder %s4823_s19, %s4071_s18  ;;  %p4080_p4 = scmp.lt.s32.totalorder %s4071_s18, %s4071_s18 }
  0x34   : > { %p4074_p0 = pnand %p4072_p13, %p4850_p8  ;;  %p4081_p7 = por %p4080_p4, %p4079_p5 }
  0x36   : > { %p4075_p2 = pneg %p4074_p0 }
  0x38   : > { %p4082_p9 = pnand %p4081_p7, %p4075_p2 }
  0x3a   : > { %4085 = shalt.err (!%p4082_p9)
}
  0x3b   : > { %s5695_s20 = smov 64   ;;  %s5696_s17 = smov 4  }
  0x3c   : > { %3791 = dma.hbm_to_vmem [thread:$0]  (!%p4834_p6), %s5718_s0, 1024, %s4823_s19, [#allocation7], %s5695_s20, %s5695_s20, %s5696_s17  }
  0x3d   : > { %s5720_s3 = sld [smem:[#allocation53_spill]] }
  0x43   : > { %s4086_s18 = scalar_lea.hbm %s5720_s3, 1024 }
  0x44   : > { %p4087_p4 = scmp.ne.s32.totalorder %s5720_s3, %s4086_s18  ;;  %p4093_p12 = scmp.lt.u32.totalorder %s4086_s18, %s5720_s3 }
  0x46   : > { %p4089_p10 = pnand %p4087_p4, %p4850_p8 }
  0x48   : > { %p4090_p11 = pneg %p4089_p10 }
  0x4a   : > { %p4095_p13 = pnand %p4093_p12, %p4090_p11 }
  0x4c   : > { %4098 = shalt.err (!%p4095_p13)
}
  0x4d   : > { %s4099_s19 = scalar_lea.vmem %s4838_s22, 1024  ;;  %p4107_p7 = scmp.lt.s32.totalorder %s4838_s22, %s4838_s22 }
  0x4e   : > { %p4100_p0 = scmp.ne.s32.totalorder %s4838_s22, %s4099_s19  ;;  %p4108_p9 = scmp.lt.s32.totalorder %s4099_s19, %s4099_s19 }
  0x50   : > { %p4102_p2 = pnand %p4100_p0, %p4850_p8  ;;  %p4109_p4 = por %p4108_p9, %p4107_p7 }
  0x52   : > { %p4103_p5 = pneg %p4102_p2 }
  0x54   : > { %p4110_p10 = pnand %p4109_p4, %p4103_p5 }
  0x56   : > { %4113 = shalt.err (!%p4110_p10)
}
  0x57   : > { %3797 = dma.hbm_to_vmem [thread:$0]  (!%p4834_p6), %s5720_s3, 1024, %s4838_s22, [#allocation10], %s5695_s20, %s5695_s20, %s5696_s17  }
  0x58   : > { %s5721_s5 = sld [smem:[#allocation55_spill]] }
  0x5e   : > { %s4114_s1 = scalar_lea.hbm %s5721_s5, 1024 }
  0x5f   : > { %p4115_p11 = scmp.ne.s32.totalorder %s5721_s5, %s4114_s1  ;;  %p4121_p0 = scmp.lt.u32.totalorder %s4114_s1, %s5721_s5 }
  0x61   : > { %p4117_p12 = pnand %p4115_p11, %p4850_p8 }
  0x63   : > { %p4118_p13 = pneg %p4117_p12 }
  0x65   : > { %p4123_p2 = pnand %p4121_p0, %p4118_p13 }
  0x67   : > { %4126 = shalt.err (!%p4123_p2)
}
  0x68   : > { %s4127_s22 = scalar_lea.vmem %s4840_s24, 1024  ;;  %p4135_p4 = scmp.lt.s32.totalorder %s4840_s24, %s4840_s24 }
  0x69   : > { %p4128_p5 = scmp.ne.s32.totalorder %s4840_s24, %s4127_s22  ;;  %p4136_p10 = scmp.lt.s32.totalorder %s4127_s22, %s4127_s22 }
  0x6b   : > { %p4130_p7 = pnand %p4128_p5, %p4850_p8  ;;  %p4137_p11 = por %p4136_p10, %p4135_p4 }
  0x6d   : > { %p4131_p9 = pneg %p4130_p7 }
  0x6f   : > { %p4138_p12 = pnand %p4137_p11, %p4131_p9 }
  0x71   : > { %4141 = shalt.err (!%p4138_p12)
}
  0x72   : > { %3803 = dma.hbm_to_vmem [thread:$0]  (!%p4834_p6), %s5721_s5, 1024, %s4840_s24, [#allocation13], %s5695_s20, %s5695_s20, %s5696_s17  }
  0x73   : > { %s4673_s28 = smov [#allocation15]   ;;  %s4674_s30 = smov [#allocation18]  }
  0x74   : > { %s555_s29 = sshll.u32 %s4673_s28, 4  ;;  %s580_s1 = sshll.u32 %s4674_s30, 4  ;;  %s556_s29 = int_to_ptr.vmem [resolvable:$true] %s555_s29  ;;  %s581_s1 = int_to_ptr.vmem [resolvable:$true] %s580_s1 }
  0x75   : > { %s4142_s23 = scalar_lea.hbm %s5667_s7, 256 }
  0x76   : > { %p4143_p13 = scmp.ne.s32.totalorder %s5667_s7, %s4142_s23  ;;  %p4149_p5 = scmp.lt.u32.totalorder %s4142_s23, %s5667_s7 }
  0x78   : > { %p4145_p0 = pnand %p4143_p13, %p4850_p8 }
  0x7a   : > { %p4146_p2 = pneg %p4145_p0 }
  0x7c   : > { %p4151_p7 = pnand %p4149_p5, %p4146_p2 }
  0x7e   : > { %4154 = shalt.err (!%p4151_p7)
}
  0x7f   : > { %s4155_s24 = scalar_lea.vmem %s556_s29, 256  ;;  %p4163_p11 = scmp.lt.s32.totalorder %s556_s29, %s556_s29 }
  0x80   : > { %p4156_p9 = scmp.ne.s32.totalorder %s556_s29, %s4155_s24  ;;  %p4164_p12 = scmp.lt.s32.totalorder %s4155_s24, %s4155_s24 }
  0x82   : > { %p4158_p4 = pnand %p4156_p9, %p4850_p8  ;;  %p4165_p1 = por %p4164_p12, %p4163_p11 }
  0x84   : > { %p4159_p10 = pneg %p4158_p4 }
  0x86   : > { %p4166_p3 = pnand %p4165_p1, %p4159_p10 }
  0x88   : > { %4169 = shalt.err (!%p4166_p3)
}
  0x89   : > { %3809 = dma.hbm_to_vmem [thread:$0]  (!%p4834_p6), %s5667_s7, 256, %s556_s29, [#allocation16], %s5695_s20, %s5695_s20, %s5696_s17  }
  0x8a   : > { %s4170_s25 = scalar_lea.hbm %s5669_s9, 16 }
  0x8b   : > { %p4171_p1 = scmp.ne.s32.totalorder %s5669_s9, %s4170_s25  ;;  %p4177_p0 = scmp.lt.u32.totalorder %s4170_s25, %s5669_s9 }
  0x8d   : > { %p4173_p3 = pnand %p4171_p1, %p4850_p8 }
  0x8f   : > { %p4174_p13 = pneg %p4173_p3 }
  0x91   : > { %p4179_p2 = pnand %p4177_p0, %p4174_p13 }
  0x93   : > { %4182 = shalt.err (!%p4179_p2)
}
  0x94   : > { %s4183_s19 = scalar_lea.vmem %s581_s1, 16  ;;  %s4190_s29 = scalar_lea.vmem %s581_s1, 32 }
  0x95   : > { %p4184_p5 = scmp.ne.s32.totalorder %s581_s1, %s4183_s19  ;;  %p4191_p4 = scmp.lt.s32.totalorder %s581_s1, %s581_s1 }
  0x96   : > { %p4192_p10 = scmp.lt.s32.totalorder %s4190_s29, %s4183_s19 }
  0x97   : > { %p4186_p7 = pnand %p4184_p5, %p4850_p8 }
  0x98   : > { %p4193_p11 = por %p4192_p10, %p4191_p4 }
  0x99   : > { %p4187_p9 = pneg %p4186_p7 }
  0x9b   : > { %p4194_p12 = pnand %p4193_p11, %p4187_p9 }
  0x9d   : > { %4197 = shalt.err (!%p4194_p12)
}
  0x9e   : > { %3815 = dma.hbm_to_vmem [thread:$0]  (!%p4834_p6), %s5669_s9, 16, %s581_s1, [#allocation19]  }
  0x9f   : > { %s4675_s27 = smov [#allocation21]   ;;  %s4198_s26 = scalar_lea.hbm %s5671_s11, 256 }
  0xa0   : > { %s601_s28 = sshll.u32 %s4675_s27, 4  ;;  %p4199_p1 = scmp.ne.s32.totalorder %s5671_s11, %s4198_s26  ;;  %s602_s28 = int_to_ptr.vmem [resolvable:$true] %s601_s28 }
  0xa1   : > { %p4205_p0 = scmp.lt.u32.totalorder %s4198_s26, %s5671_s11 }
  0xa2   : > { %p4201_p3 = pnand %p4199_p1, %p4850_p8 }
  0xa4   : > { %p4202_p13 = pneg %p4201_p3 }
  0xa6   : > { %p4207_p2 = pnand %p4205_p0, %p4202_p13 }
  0xa8   : > { %4210 = shalt.err (!%p4207_p2)
}
  0xa9   : > { %s4211_s1 = scalar_lea.vmem %s602_s28, 256  ;;  %p4219_p4 = scmp.lt.s32.totalorder %s602_s28, %s602_s28 }
  0xaa   : > { %p4212_p5 = scmp.ne.s32.totalorder %s602_s28, %s4211_s1  ;;  %p4220_p10 = scmp.lt.s32.totalorder %s4211_s1, %s4211_s1 }
  0xac   : > { %p4214_p7 = pnand %p4212_p5, %p4850_p8  ;;  %p4221_p11 = por %p4220_p10, %p4219_p4 }
  0xae   : > { %p4215_p9 = pneg %p4214_p7 }
  0xb0   : > { %p4222_p12 = pnand %p4221_p11, %p4215_p9 }
  0xb2   : > { %4225 = shalt.err (!%p4222_p12)
}
  0xb3   : > { %3821 = dma.hbm_to_vmem [thread:$0]  (!%p4834_p6), %s5671_s11, 256, %s602_s28, [#allocation22], %s5695_s20, %s5695_s20, %s5696_s17  }
  0xb4   : > { %s4676_s0 = smov [#allocation24]   ;;  %s4226_s26 = scalar_lea.hbm %s5673_s13, 1024 }
  0xb5   : > { %s625_s27 = sshll.u32 %s4676_s0, 4  ;;  %p4227_p1 = scmp.ne.s32.totalorder %s5673_s13, %s4226_s26  ;;  %s626_s27 = int_to_ptr.vmem [resolvable:$true] %s625_s27 }
  0xb6   : > { %p4233_p0 = scmp.lt.u32.totalorder %s4226_s26, %s5673_s13 }
  0xb7   : > { %p4229_p3 = pnand %p4227_p1, %p4850_p8 }
  0xb9   : > { %p4230_p13 = pneg %p4229_p3 }
  0xbb   : > { %p4235_p2 = pnand %p4233_p0, %p4230_p13 }
  0xbd   : > { %4238 = shalt.err (!%p4235_p2)
}
  0xbe   : > { %s4239_s28 = scalar_lea.vmem %s626_s27, 1024  ;;  %p4247_p4 = scmp.lt.s32.totalorder %s626_s27, %s626_s27 }
  0xbf   : > { %p4240_p5 = scmp.ne.s32.totalorder %s626_s27, %s4239_s28  ;;  %p4248_p10 = scmp.lt.s32.totalorder %s4239_s28, %s4239_s28 }
  0xc1   : > { %p4242_p7 = pnand %p4240_p5, %p4850_p8  ;;  %p4249_p11 = por %p4248_p10, %p4247_p4 }
  0xc3   : > { %p4243_p9 = pneg %p4242_p7 }
  0xc5   : > { %p4250_p12 = pnand %p4249_p11, %p4243_p9 }
  0xc7   : > { %4253 = shalt.err (!%p4250_p12)
}
  0xc8   : > { %s4677_s1 = smov 256   ;;  %s4678_s29 = smov 16  }
  0xc9   : > { %3827 = dma.hbm_to_vmem [thread:$0]  (!%p4834_p6), %s5673_s13, 1024, %s626_s27, [#allocation25], %s4677_s1, %s4677_s1, %s4678_s29  }
  0xca   : > { %s4679_s30 = smov [#allocation27]   ;;  %s4680_s26 = smov [#allocation8]  }
  0xcb   : > { %s649_s25 = sshll.u32 %s4679_s30, 4  ;;  %s490_s23 = sshll.u32 %s4680_s26, 4  ;;  %s650_s25 = int_to_ptr.vmem [resolvable:$true] %s649_s25  ;;  %s491_s23 = int_to_ptr.vmem [resolvable:$true] %s490_s23 }
  0xcc   : > { %s4254_s19 = scalar_lea.hbm %s5675_s15, 4096 }
  0xcd   : > { %p4255_p1 = scmp.ne.s32.totalorder %s5675_s15, %s4254_s19  ;;  %p4261_p0 = scmp.lt.u32.totalorder %s4254_s19, %s5675_s15 }
  0xcf   : > { %p4257_p3 = pnand %p4255_p1, %p4850_p8 }
  0xd1   : > { %p4258_p13 = pneg %p4257_p3 }
  0xd3   : > { %p4263_p2 = pnand %p4261_p0, %p4258_p13 }
  0xd5   : > { %4266 = shalt.err (!%p4263_p2)
}
  0xd6   : > { %s4267_s27 = scalar_lea.vmem %s650_s25, 4096  ;;  %p4275_p4 = scmp.lt.s32.totalorder %s650_s25, %s650_s25 }
  0xd7   : > { %p4268_p5 = scmp.ne.s32.totalorder %s650_s25, %s4267_s27  ;;  %p4276_p10 = scmp.lt.s32.totalorder %s4267_s27, %s4267_s27 }
  0xd9   : > { %p4270_p7 = pnand %p4268_p5, %p4850_p8  ;;  %p4277_p11 = por %p4276_p10, %p4275_p4 }
  0xdb   : > { %p4271_p9 = pneg %p4270_p7 }
  0xdd   : > { %p4278_p12 = pnand %p4277_p11, %p4271_p9 }
  0xdf   : > { %4281 = shalt.err (!%p4278_p12)
}
  0xe0   : > { %s5722_s20 = smov 4   ;;  %s5723_s1 = smov 64  }
  0xe1   : > { %3833 = dma.hbm_to_vmem [thread:$0]  (!%p4834_p6), %s5675_s15, 4096, %s650_s25, [#allocation28], %s5723_s1, %s5723_s1, %s5722_s20  }
  0xe2   : > { %s5724_s30 = sld [smem:[#allocation52_spill]] }
  0xe8   : > { %s5725_s26 = smov %s5724_s30  ;;  %s4282_s18 = scalar_lea.hbm %s5724_s30, 64 }
  0xe9   : > { %p4283_p1 = scmp.ne.s32.totalorder %s5725_s26, %s4282_s18  ;;  %p4289_p0 = scmp.lt.u32.totalorder %s4282_s18, %s5725_s26 }
  0xeb   : > { %p4285_p3 = pnand %p4283_p1, %p4850_p8 }
  0xed   : > { %p4286_p13 = pneg %p4285_p3 }
  0xef   : > { %p4291_p2 = pnand %p4289_p0, %p4286_p13 }
  0xf1   : > { %4294 = shalt.err (!%p4291_p2)
}
  0xf2   : > { %s4295_s3 = scalar_lea.vmem %s491_s23, 64  ;;  %p4303_p4 = scmp.lt.s32.totalorder %s491_s23, %s491_s23 }
  0xf3   : > { %p4296_p5 = scmp.ne.s32.totalorder %s491_s23, %s4295_s3  ;;  %p4304_p10 = scmp.lt.s32.totalorder %s4295_s3, %s4295_s3 }
  0xf5   : > { %p4298_p7 = pnand %p4296_p5, %p4850_p8  ;;  %p4305_p11 = por %p4304_p10, %p4303_p4 }
  0xf7   : > { %p4299_p9 = pneg %p4298_p7 }
  0xf9   : > { %p4306_p12 = pnand %p4305_p11, %p4299_p9 }
  0xfb   : > { %4309 = shalt.err (!%p4306_p12)
}
  0xfc   : > { %s4681_s25 = smov 1   ;;  %s4682_s17 = smov [#allocation11]  }
  0xfd   : > { %3794 = dma.hbm_to_vmem [thread:$0]  (!%p4834_p6), %s5725_s26, 64, %s491_s23, [#allocation7], %s4678_s29, %s4678_s29, %s4681_s25  }
  0xfe   : > { %s516_s24 = sshll.u32 %s4682_s17, 4  ;;  %s4683_s0 = smov [#allocation14]   ;;  %s517_s24 = int_to_ptr.vmem [resolvable:$true] %s516_s24 }
  0xff   : > { %s542_s30 = sshll.u32 %s4683_s0, 4  ;;  %s5726_s4 = sld [smem:[#allocation54_spill]]  ;;  %s5047_s30 = int_to_ptr.vmem [resolvable:$true] %s542_s30 }
 0x105   : > { %s4310_s19 = scalar_lea.hbm %s5726_s4, 64 }
 0x106   : > { %p4311_p1 = scmp.ne.s32.totalorder %s5726_s4, %s4310_s19  ;;  %p4317_p0 = scmp.lt.u32.totalorder %s4310_s19, %s5726_s4 }
 0x108   : > { %p4313_p3 = pnand %p4311_p1, %p4850_p8 }
 0x10a   : > { %p4314_p13 = pneg %p4313_p3 }
 0x10c   : > { %p4319_p2 = pnand %p4317_p0, %p4314_p13 }
 0x10e   : > { %4322 = shalt.err (!%p4319_p2)
}
 0x10f   : > { %s4323_s20 = scalar_lea.vmem %s517_s24, 64  ;;  %p4331_p4 = scmp.lt.s32.totalorder %s517_s24, %s517_s24 }
 0x110   : > { %p4324_p5 = scmp.ne.s32.totalorder %s517_s24, %s4323_s20  ;;  %p4332_p10 = scmp.lt.s32.totalorder %s4323_s20, %s4323_s20 }
 0x112   : > { %p4326_p7 = pnand %p4324_p5, %p4850_p8  ;;  %p4333_p11 = por %p4332_p10, %p4331_p4 }
 0x114   : > { %p4327_p9 = pneg %p4326_p7 }
 0x116   : > { %p4334_p12 = pnand %p4333_p11, %p4327_p9 }
 0x118   : > { %4337 = shalt.err (!%p4334_p12)
}
 0x119   : > { %3800 = dma.hbm_to_vmem [thread:$0]  (!%p4834_p6), %s5726_s4, 64, %s517_s24, [#allocation10], %s4678_s29, %s4678_s29, %s4681_s25  }
 0x11a   : > { %s5727_s6 = sld [smem:[#allocation56_spill]] }
 0x120   : > { %s4338_s22 = scalar_lea.hbm %s5727_s6, 64 }
 0x121   : > { %p4339_p1 = scmp.ne.s32.totalorder %s5727_s6, %s4338_s22  ;;  %p4345_p0 = scmp.lt.u32.totalorder %s4338_s22, %s5727_s6 }
 0x123   : > { %p4341_p3 = pnand %p4339_p1, %p4850_p8 }
 0x125   : > { %p4342_p13 = pneg %p4341_p3 }
 0x127   : > { %p4347_p2 = pnand %p4345_p0, %p4342_p13 }
 0x129   : > { %4350 = shalt.err (!%p4347_p2)
}
 0x12a   : > { %s4351_s24 = scalar_lea.vmem %s5047_s30, 64  ;;  %p4359_p4 = scmp.lt.s32.totalorder %s5047_s30, %s5047_s30 }
 0x12b   : > { %p4352_p5 = scmp.ne.s32.totalorder %s5047_s30, %s4351_s24  ;;  %p4360_p10 = scmp.lt.s32.totalorder %s4351_s24, %s4351_s24 }
 0x12d   : > { %p4354_p7 = pnand %p4352_p5, %p4850_p8  ;;  %p4361_p11 = por %p4360_p10, %p4359_p4 }
 0x12f   : > { %p4355_p9 = pneg %p4354_p7 }
 0x131   : > { %p4362_p12 = pnand %p4361_p11, %p4355_p9 }
 0x133   : > { %4365 = shalt.err (!%p4362_p12)
}
 0x134   : > { %3806 = dma.hbm_to_vmem [thread:$0]  (!%p4834_p6), %s5727_s6, 64, %s5047_s30, [#allocation13], %s4678_s29, %s4678_s29, %s4681_s25  }
 0x135   : > { %s4684_s1 = smov [#allocation17]   ;;  %s4685_s0 = smov [#allocation20]  }
 0x136   : > { %s569_s17 = sshll.u32 %s4684_s1, 4  ;;  %s591_s18 = sshll.u32 %s4685_s0, 4  ;;  %s570_s17 = int_to_ptr.vmem [resolvable:$true] %s569_s17  ;;  %s5096_s18 = int_to_ptr.vmem [resolvable:$true] %s591_s18 }
 0x137   : > { %s4366_s28 = scalar_lea.hbm %s5668_s8, 16 }
 0x138   : > { %p4367_p1 = scmp.ne.s32.totalorder %s5668_s8, %s4366_s28  ;;  %p4373_p0 = scmp.lt.u32.totalorder %s4366_s28, %s5668_s8 }
 0x13a   : > { %p4369_p3 = pnand %p4367_p1, %p4850_p8 }
 0x13c   : > { %p4370_p13 = pneg %p4369_p3 }
 0x13e   : > { %p4375_p2 = pnand %p4373_p0, %p4370_p13 }
 0x140   : > { %4378 = shalt.err (!%p4375_p2)
}
 0x141   : > { %s4379_s23 = scalar_lea.vmem %s570_s17, 16  ;;  %s4386_s20 = scalar_lea.vmem %s570_s17, 32 }
 0x142   : > { %p4380_p5 = scmp.ne.s32.totalorder %s570_s17, %s4379_s23  ;;  %p4387_p4 = scmp.lt.s32.totalorder %s570_s17, %s570_s17 }
 0x143   : > { %p4388_p10 = scmp.lt.s32.totalorder %s4386_s20, %s4379_s23 }
 0x144   : > { %p4382_p7 = pnand %p4380_p5, %p4850_p8 }
 0x145   : > { %p4389_p11 = por %p4388_p10, %p4387_p4 }
 0x146   : > { %p4383_p9 = pneg %p4382_p7 }
 0x148   : > { %p4390_p12 = pnand %p4389_p11, %p4383_p9 }
 0x14a   : > { %4393 = shalt.err (!%p4390_p12)
}
 0x14b   : > { %3812 = dma.hbm_to_vmem [thread:$0]  (!%p4834_p6), %s5668_s8, 16, %s570_s17, [#allocation16]  }
 0x14c   : > { %s4394_s28 = scalar_lea.hbm %s5670_s10, 16 }
 0x14d   : > { %p4395_p1 = scmp.ne.s32.totalorder %s5670_s10, %s4394_s28  ;;  %p4401_p0 = scmp.lt.u32.totalorder %s4394_s28, %s5670_s10 }
 0x14f   : > { %p4397_p3 = pnand %p4395_p1, %p4850_p8 }
 0x151   : > { %p4398_p13 = pneg %p4397_p3 }
 0x153   : > { %p4403_p2 = pnand %p4401_p0, %p4398_p13 }
 0x155   : > { %4406 = shalt.err (!%p4403_p2)
}
 0x156   : > { %s4407_s17 = scalar_lea.vmem %s5096_s18, 16  ;;  %s4414_s23 = scalar_lea.vmem %s5096_s18, 32 }
 0x157   : > { %p4408_p5 = scmp.ne.s32.totalorder %s5096_s18, %s4407_s17  ;;  %p4415_p4 = scmp.lt.s32.totalorder %s5096_s18, %s5096_s18 }
 0x158   : > { %p4416_p10 = scmp.lt.s32.totalorder %s4414_s23, %s4407_s17 }
 0x159   : > { %p4410_p7 = pnand %p4408_p5, %p4850_p8 }
 0x15a   : > { %p4417_p11 = por %p4416_p10, %p4415_p4 }
 0x15b   : > { %p4411_p9 = pneg %p4410_p7 }
 0x15d   : > { %p4418_p12 = pnand %p4417_p11, %p4411_p9 }
 0x15f   : > { %4421 = shalt.err (!%p4418_p12)
}
 0x160   : > { %3818 = dma.hbm_to_vmem [thread:$0]  (!%p4834_p6), %s5670_s10, 16, %s5096_s18, [#allocation19]  }
 0x161   : > { %s4686_s0 = smov [#allocation23]   ;;  %s4687_s19 = smov [#allocation26]  }
 0x162   : > { %s615_s22 = sshll.u32 %s4686_s0, 4  ;;  %s639_s28 = sshll.u32 %s4687_s19, 4  ;;  %s616_s22 = int_to_ptr.vmem [resolvable:$true] %s615_s22  ;;  %s5140_s28 = int_to_ptr.vmem [resolvable:$true] %s639_s28 }
 0x163   : > { %s4422_s24 = scalar_lea.hbm %s5672_s12, 16 }
 0x164   : > { %p4423_p1 = scmp.ne.s32.totalorder %s5672_s12, %s4422_s24  ;;  %p4429_p0 = scmp.lt.u32.totalorder %s4422_s24, %s5672_s12 }
 0x166   : > { %p4425_p3 = pnand %p4423_p1, %p4850_p8 }
 0x168   : > { %p4426_p13 = pneg %p4425_p3 }
 0x16a   : > { %p4431_p2 = pnand %p4429_p0, %p4426_p13 }
 0x16c   : > { %4434 = shalt.err (!%p4431_p2)
}
 0x16d   : > { %s4435_s20 = scalar_lea.vmem %s616_s22, 16  ;;  %s4442_s1 = scalar_lea.vmem %s616_s22, 32 }
 0x16e   : > { %p4436_p5 = scmp.ne.s32.totalorder %s616_s22, %s4435_s20  ;;  %p4443_p4 = scmp.lt.s32.totalorder %s616_s22, %s616_s22 }
 0x16f   : > { %p4444_p10 = scmp.lt.s32.totalorder %s4442_s1, %s4435_s20 }
 0x170   : > { %p4438_p7 = pnand %p4436_p5, %p4850_p8 }
 0x171   : > { %p4445_p11 = por %p4444_p10, %p4443_p4 }
 0x172   : > { %p4439_p9 = pneg %p4438_p7 }
 0x174   : > { %p4446_p12 = pnand %p4445_p11, %p4439_p9 }
 0x176   : > { %4449 = shalt.err (!%p4446_p12)
}
 0x177   : > { %3824 = dma.hbm_to_vmem [thread:$0]  (!%p4834_p6), %s5672_s12, 16, %s616_s22, [#allocation22]  }
 0x178   : > { %s4450_s24 = scalar_lea.hbm %s5674_s14, 64 }
 0x179   : > { %p4451_p1 = scmp.ne.s32.totalorder %s5674_s14, %s4450_s24  ;;  %p4457_p0 = scmp.lt.u32.totalorder %s4450_s24, %s5674_s14 }
 0x17b   : > { %p4453_p3 = pnand %p4451_p1, %p4850_p8 }
 0x17d   : > { %p4454_p13 = pneg %p4453_p3 }
 0x17f   : > { %p4459_p2 = pnand %p4457_p0, %p4454_p13 }
 0x181   : > { %4462 = shalt.err (!%p4459_p2)
}
 0x182   : > { %s4463_s22 = scalar_lea.vmem %s5140_s28, 64  ;;  %p4471_p4 = scmp.lt.s32.totalorder %s5140_s28, %s5140_s28 }
 0x183   : > { %p4464_p5 = scmp.ne.s32.totalorder %s5140_s28, %s4463_s22  ;;  %p4472_p10 = scmp.lt.s32.totalorder %s4463_s22, %s4463_s22 }
 0x185   : > { %p4466_p7 = pnand %p4464_p5, %p4850_p8  ;;  %p4473_p11 = por %p4472_p10, %p4471_p4 }
 0x187   : > { %p4467_p9 = pneg %p4466_p7 }
 0x189   : > { %p4474_p12 = pnand %p4473_p11, %p4467_p9 }
 0x18b   : > { %4477 = shalt.err (!%p4474_p12)
}
 0x18c   : > { %3830 = dma.hbm_to_vmem [thread:$0]  (!%p4834_p6), %s5674_s14, 64, %s5140_s28, [#allocation25]  }
 0x18d   : > { %s4688_s0 = smov [#allocation29]   ;;  %s4478_s24 = scalar_lea.hbm %s5676_s16, 64 }
 0x18e   : > { %s662_s19 = sshll.u32 %s4688_s0, 4  ;;  %p4479_p1 = scmp.ne.s32.totalorder %s5676_s16, %s4478_s24  ;;  %s663_s19 = int_to_ptr.vmem [resolvable:$true] %s662_s19 }
 0x18f   : > { %p4485_p0 = scmp.lt.u32.totalorder %s4478_s24, %s5676_s16 }
 0x190   : > { %p4481_p3 = pnand %p4479_p1, %p4850_p8 }
 0x192   : > { %p4482_p13 = pneg %p4481_p3 }
 0x194   : > { %p4487_p2 = pnand %p4485_p0, %p4482_p13 }
 0x196   : > { %4490 = shalt.err (!%p4487_p2)
}
 0x197   : > { %s4491_s28 = scalar_lea.vmem %s663_s19, 64  ;;  %p4499_p4 = scmp.lt.s32.totalorder %s663_s19, %s663_s19 }
 0x198   : > { %p4492_p5 = scmp.ne.s32.totalorder %s663_s19, %s4491_s28  ;;  %p4500_p10 = scmp.lt.s32.totalorder %s4491_s28, %s4491_s28 }
 0x19a   : > { %p4494_p7 = pnand %p4492_p5, %p4850_p8  ;;  %p4501_p11 = por %p4500_p10, %p4499_p4 }
 0x19c   : > { %p4495_p9 = pneg %p4494_p7 }
 0x19e   : > { %p4502_p12 = pnand %p4501_p11, %p4495_p9 }
 0x1a0   : > { %4505 = shalt.err (!%p4502_p12)
}
 0x1a1   : > { %s5728_s1 = sld [smem:[#allocation47_spill]]  ;;  %s5729_s0 = sld [smem:[#allocation46_spill]] }
 0x1a2   : > { %s5730_s21 = sld [smem:[#allocation45_spill]]  ;;  %s5731_s27 = sld [smem:[#allocation44_spill]] }
 0x1a3   : > { %s5732_s3 = sld [smem:[#allocation48_spill]] }
 0x1a4   : > { %3836 = dma.hbm_to_vmem [thread:$0]  (!%p4834_p6), %s5676_s16, 64, %s663_s19, [#allocation28], %s4678_s29, %s4678_s29, %s4681_s25  }
 0x1a7   : > { %s3223_s2 = sadd.s32 4294967294, %s5728_s1   ;;  %s5206_s30 = sadd.s32 1, %s5728_s1  }
 0x1a8   : > { %s53_s24 = sadd.s32 1, %s5729_s0  ;;  %s50_s17 = ssub.s32 %s5728_s1, %s5206_s30 }
 0x1a9   : > { %p60_p8 = scmp.ne.s32.totalorder %s5729_s0, %s5730_s21  ;;  %p51_p1 = scmp.eq.s32.totalorder %s50_s17, 0 }
 0x1aa   : > { %p61_p3 = scmp.eq.s32.totalorder %s5728_s1, 0  ;;  %p66_p13 = scmp.ne.s32.totalorder %s5730_s21, %s5731_s27 }
 0x1ab   : > { %p426_p0 = scmp.eq.s32.totalorder %s5732_s3, 1  ;;  %p5733_p5 = scmp.eq.s32.totalorder %s5732_s3, 0 }
 0x1ac   : > { %s5218_s23 = scalar_select %p51_p1, %s5729_s0, %s53_s24  }
 0x1ad   : > { %p62_p2 = por %p61_p3, %p60_p8  ;;  %p5222_p7 = por %p5733_p5, %p66_p13 }
 0x1ae   : > { %p5226_p6 = por %p426_p0, %p60_p8  ;;  %p432_p9 = scmp.eq.s32.totalorder %s3223_s2, 1 }
 0x1af   : > { %p3864_p4 = scmp.lt.s32.totalorder %s5728_s1, 2  ;;  %s676_s25 = sand.u32 1, %s5729_s0  }
 0x1b0   : > { %s5735_s29 = scalar_select %p5226_p6, 1, 0 }
 0x1b1   : > { %p5232_p10 = por %p432_p9, %p66_p13  ;;  %s3242_s28 = sshll.u32 %s676_s25, 3 }
 0x1b2   : > { %s3243_s22 = sshll.u32 %s5728_s1, 7  ;;  %s5737_s27 = sld [smem:[#allocation50_spill]] }
 0x1b3   : > { %s5736_s19 = scalar_select %p5232_p10, 1, 0 }
 0x1b4   : > { %s680_s17 = scalar_lea.vmem [#allocation3], %s3242_s28  ;;  %p5242_p11 = pnand %p3864_p4, %p62_p2 }
 0x1b5   : > { %s687_s4 = sshll.u32 %s680_s17, 4  ;;  %s677_s1 = scalar_lea.sflag [#allocation4], %s676_s25  ;;  %s5246_s4 = int_to_ptr.vmem [resolvable:$true] %s687_s4 }
 0x1b6   : > { %p4508_p8 = pneg %p5242_p11 }
 0x1b8   : > { %s5738_s3 = smov %s5737_s27  ;;  %s5240_s24 = scalar_lea.hbm %s5737_s27, %s3243_s22 }
 0x1b9   : > { %s4506_s0 = scalar_lea.hbm %s5240_s24, 128  ;;  %s4511_s20 = scalar_lea.hbm %s5738_s3, 256 }
 0x1ba   : > { %p4507_p12 = scmp.ne.s32.totalorder %s5240_s24, %s4506_s0  ;;  %p4512_p13 = scmp.lt.u32.totalorder %s5240_s24, %s5738_s3 }
 0x1bb   : > { %p4513_p0 = scmp.lt.u32.totalorder %s4511_s20, %s4506_s0  ;;  %p4515_p5 = scmp.lt.u32.totalorder %s4506_s0, %s5240_s24 }
 0x1bc   : > { %p4509_p1 = pnand %p4508_p8, %p4507_p12 }
 0x1bd   : > { %p4514_p2 = por %p4513_p0, %p4512_p13 }
 0x1be   : > { %p4510_p3 = pneg %p4509_p1 }
 0x1bf   : > { %p4516_p9 = por %p4515_p5, %p4514_p2 }
 0x1c1   : > { %p4517_p4 = pnand %p4516_p9, %p4510_p3 }
 0x1c3   : > { %4520 = shalt.err (!%p4517_p4)
}
 0x1c4   : > { %s4521_s25 = scalar_lea.vmem %s5246_s4, 128  ;;  %s4689_s17 = smov [#allocation3]  }
 0x1c5   : > { %p4522_p12 = scmp.ne.s32.totalorder %s5246_s4, %s4521_s25  ;;  %s4526_s22 = sshll.u32 %s4689_s17, 4  ;;  %s4527_s22 = int_to_ptr.vmem [resolvable:$false] %s4526_s22 }
 0x1c6   : > { %s4528_s28 = scalar_lea.vmem %s4527_s22, 256  ;;  %p4529_p6 = scmp.lt.s32.totalorder %s5246_s4, %s4527_s22 }
 0x1c7   : > { %p4524_p1 = pnand %p4522_p12, %p4508_p8  ;;  %p4530_p13 = scmp.lt.s32.totalorder %s4528_s28, %s4521_s25 }
 0x1c9   : > { %p4525_p10 = pneg %p4524_p1  ;;  %p4531_p0 = por %p4530_p13, %p4529_p6 }
 0x1cb   : > { %p4532_p2 = pnand %p4531_p0, %p4525_p10 }
 0x1cd   : > { %4535 = shalt.err (!%p4532_p2)
}
 0x1ce   : > { %3840 = dma.hbm_to_vmem [thread:$0]  (!%p5242_p11), %s5240_s24, 128, %s5246_s4, %s677_s1  }
 0x1cf   : > { %s5740_s0 = sld [smem:[#allocation49_spill]] }
 0x1d5   : > { %p5741_p3 = scmp.ne.s32.totalorder %s5740_s0, 0 }
 0x1d6   : > { %s5742_s20 = sld [smem:[#allocation45_spill]] (!%p5741_p3) }
 0x1d7   : > { %696 = sbr.rel (%p5741_p3) target bundleno = 3773 (0xebd), region = 88 }
 0x1dc   : > { %s5276_s21 = sand.u32 (!%p5741_p3), 1, %s5742_s20  }
 0x1dd   : > { %s5698_s27 = sshll.u32 (!%p5741_p3), %s5276_s21, 3  ;;  %s699_s25 = scalar_lea.sflag (!%p5741_p3), [#allocation4], %s5276_s21 }
 0x1de   : > { %s5282_s17 = scalar_lea.vmem [#allocation3], %s5698_s27 }
 0x1df   : > { %4609 = dma.done.wait (%p5222_p7), %s699_s25, 128  }
 0x1e0   : > { %4611 = vsyncadd (%p5222_p7), %s699_s25, 4294967168  ;;  %s5743_s4 = sld [smem:[#allocation48_spill]] }
 0x1e6   : > { %p5744_p6 = scmp.eq.s32.totalorder %s5743_s4, 0 }
 0x1e8   : > { %4613 = dma.done.wait (%p5744_p6), [#allocation7], 1088   ;;  %p5745_p10 = pmov %p5744_p6 }
 0x1e9   : > { %p5746_p11 = pmov %p5744_p6 }
 0x1ea   : > { %4615 = vsyncadd (%p5745_p10), [#allocation7], 4294966208 }
 0x1eb   : > { %4617 = dma.done.wait (%p5746_p11), [#allocation10], 1088   ;;  %p5747_p8 = pmov %p5744_p6 }
 0x1ec   : > { %p5748_p5 = pmov %p5744_p6 }
 0x1ed   : > { %4619 = vsyncadd (%p5747_p8), [#allocation10], 4294966208 }
 0x1ee   : > { %4621 = dma.done.wait (%p5748_p5), [#allocation13], 1088   ;;  %p5749_p9 = pmov %p5748_p5 }
 0x1ef   : > { %p5750_p7 = pmov %p5748_p5 }
 0x1f0   : > { %4623 = vsyncadd (%p5749_p9), [#allocation13], 4294966208 }
 0x1f1   : > { %4625 = dma.done.wait (%p5750_p7), [#allocation16], 272   ;;  %p5751_p4 = pmov %p5748_p5 }
 0x1f3   : > { %4627 = vsyncadd (%p5751_p4), [#allocation16], 4294967024  ;;  %p5752_p12 = pmov %p5751_p4 }
 0x1f4   : > { %p5753_p1 = pmov %p5751_p4 }
 0x1f5   : > { %4629 = dma.done.wait (%p5752_p12), [#allocation19], 32  }
 0x1f6   : > { %4631 = vsyncadd (%p5753_p1), [#allocation19], 4294967264  ;;  %p5754_p13 = pmov %p5753_p1 }
 0x1f7   : > { %p5755_p0 = pmov %p5753_p1 }
 0x1f8   : > { %4633 = dma.done.wait (%p5754_p13), [#allocation22], 272  }
 0x1f9   : > { %4635 = vsyncadd (%p5755_p0), [#allocation22], 4294967024  ;;  %p5756_p2 = pmov %p5755_p0 }
 0x1fa   : > { %p5757_p3 = pmov %p5755_p0 }
 0x1fb   : > { %4637 = dma.done.wait (%p5756_p2), [#allocation25], 1088  }
 0x1fc   : > { %4639 = vsyncadd (%p5757_p3), [#allocation25], 4294966208  ;;  %p5758_p6 = pmov %p5755_p0 }
 0x1fd   : > { %p5759_p10 = pmov %p5755_p0 }
 0x1fe   : > { %4641 = dma.done.wait (%p5758_p6), [#allocation28], 4160  }
 0x1ff   : > { %4643 = vsyncadd (%p5759_p10), [#allocation28], 4294963136  ;;  %v4690_v0 = vmov 0.0   ;;  %vm4691_vm0 = vmmov 0   ;;  %v3950_v1 = vld [vmem:[#allocation6] sm:$0xff]   ;;  %v3951_v2 = vld [vmem:[#allocation6 + $0x10] sm:$0xff]  }
 0x200   : > { %3478 = vmatprep.subr.bf16.mxu0 %v4690_v0  ;;  %3486 = vmatprep.subr.bf16.mxu1 %v4690_v0  ;;  %v3952_v3 = vld [vmem:[#allocation6 + $0x8] sm:$0xff]   ;;  %v3953_v4 = vld [vmem:[#allocation6 + $0x18] sm:$0xff]   ;;  %vm883_vm1 = vcmask 261120   ;;  %v3954_v7 = vld [vmem:[#allocation6 + $0x20] sm:$0xff]   ;;  %vm1600_vm2 = vcmask 64512   ;;  %vm1850_vm3 = vcmask 1043456  }
 0x201   : > { %3482 = vmatprep.mubr.msk.bf16.mxu0 %vm4691_vm0, %v4690_v0  ;;  %3490 = vmatprep.mubr.msk.bf16.mxu1 %vm4691_vm0, %v4690_v0  ;;  %v5329_v5 = vld [vmem:[%s5282_s17] sm:$0xff]  ;;  %v3956_v9 = vld [vmem:[#allocation6 + $0x28] sm:$0xff]   ;;  %v3969_v22 = vld [vmem:[#allocation12 + $0x18] sm:$0xff]   ;;  %s3263_s18 = sshll.u32 %s5276_s21, 5  ;;  %s5699_s2 = smov 8   ;;  %vm2037_vm5 = vcmask 130112  }
 0x202   : > { %3479 = vmatpush3.bf16.msra.mxu0 %v3950_v1  ;;  %3487 = vmatpush3.bf16.msra.mxu1 %v3951_v2  ;;  %v5333_v6 = vpack.c.bf16 %v5329_v5, %v5329_v5  ;;  %v3955_v8 = vld [vmem:[#allocation6 + $0x30] sm:$0xff]   ;;  %v3957_v10 = vld [vmem:[#allocation6 + $0x38] sm:$0xff]   ;;  %v3958_v11 = vld [vmem:[#allocation9] sm:$0xff]   ;;  %s5455_s24 = scalar_lea.vmem [#allocation31], %s3263_s18  ;;  %s4693_s1 = smov 16   ;;  %vm2043_vm6 = vcmask 195712  }
 0x203   : > { %3480 = vmatprep.subr.bf16.mxu0 %v4690_v0  ;;  %3488 = vmatprep.subr.bf16.mxu1 %v4690_v0  ;;  %v3959_v12 = vld [vmem:[#allocation9 + $0x10] sm:$0xff]   ;;  %v3960_v13 = vld [vmem:[#allocation9 + $0x8] sm:$0xff]   ;;  %v3961_v14 = vld [vmem:[#allocation9 + $0x18] sm:$0xff]   ;;  %s4694_s22 = smov 24   ;;  %vm2049_vm7 = vcmask 261312   ;;  %vm2217_vm8 = vcmask 31744  }
 0x204   : > { %v3962_v15 = vld [vmem:[#allocation9 + $0x20] sm:$0xff]   ;;  %v3963_v16 = vld [vmem:[#allocation9 + $0x30] sm:$0xff]   ;;  %v3964_v17 = vld [vmem:[#allocation9 + $0x28] sm:$0xff]   ;;  %s3383_s28 = sshll.u32 %s5743_s4, 9  ;;  %s5760_s25 = sld [smem:[#allocation58_spill]] }
 0x205   : > { %v3965_v18 = vld [vmem:[#allocation9 + $0x38] sm:$0xff]   ;;  %v3966_v19 = vld [vmem:[#allocation12] sm:$0xff]   ;;  %v3968_v21 = vld [vmem:[#allocation12 + $0x8] sm:$0xff]   ;;  %s2966_s18 = sshll.u32 %s5455_s24, 4  ;;  %p5761_p8 = scmp.ne.s32.totalorder %s5735_s29, 0  ;;  %s5580_s18 = int_to_ptr.vmem [resolvable:$true] %s2966_s18 }
 0x206   : > { %3481 = vmatpush3.bf16.msra.mxu0 %v3952_v3  ;;  %3489 = vmatpush3.bf16.msra.mxu1 %v3953_v4  ;;  %v3967_v20 = vld [vmem:[#allocation12 + $0x10] sm:$0xff]   ;;  %v3970_v23 = vld [vmem:[#allocation12 + $0x20] sm:$0xff]   ;;  %v3972_v25 = vld [vmem:[#allocation12 + $0x28] sm:$0xff]   ;;  %s4699_s27 = smov [#allocation31]  }
 0x207   : > { %3494 = vmatprep.subr.bf16.mxu0 %v4690_v0  ;;  %3502 = vmatprep.subr.bf16.mxu1 %v4690_v0  ;;  %v3971_v24 = vld [vmem:[#allocation12 + $0x30] sm:$0xff]   ;;  %v3973_v26 = vld [vmem:[#allocation12 + $0x38] sm:$0xff]  }
 0x208   : > { %v3280_v43 = vld [vmem:[#allocation11] ss:$0 sm:$0xff]  ;;  %v3281_v44 = vld [vmem:[#allocation11 + $0x1] ss:$0 sm:$0xff]  ;;  %v3264_v55 = vld [vmem:[#allocation8] ss:$0 sm:$0xff] }
 0x209   : > { %3483 = vmatmul.mubr.msk.bf16.vlgmr.msra.gmra.mrb[0].mxu0 %vm883_vm1, %v5333_v6  ;;  %3491 = vmatmul.mubr.msk.bf16.vlgmr.msra.gmra.mrb[0].mxu1 %vm883_vm1, %v5333_v6  ;;  %v3265_v58 = vld [vmem:[#allocation8 + $0x1] ss:$0 sm:$0xff]  ;;  %v3282_v61 = vld [vmem:[#allocation11 + $0x2] ss:$0 sm:$0xff]  ;;  %v3283_v63 = vld [vmem:[#allocation11 + $0x3] ss:$0 sm:$0xff] }
 0x20a   : > { %3495 = vmatpush3.bf16.msra.mxu0 %v3954_v7  ;;  %3503 = vmatpush3.bf16.msra.mxu1 %v3955_v8  ;;  %s5577_s17 = scalar_lea.hbm %s5760_s25, %s3383_s28 }
 0x20b   : > { %3496 = vmatprep.subr.bf16.mxu0 %v4690_v0  ;;  %3504 = vmatprep.subr.bf16.mxu1 %v4690_v0 }
 0x20c   : > { %3498 = vmatprep.mubr.msk.bf16.mxu0 %vm4691_vm0, %v4690_v0  ;;  %3506 = vmatprep.mubr.msk.bf16.mxu1 %vm4691_vm0, %v4690_v0 }
 0x20e   : > { %3497 = vmatpush3.bf16.msra.mxu0 %v3956_v9  ;;  %3505 = vmatpush3.bf16.msra.mxu1 %v3957_v10 }
 0x20f   : > { %3510 = vmatprep.subr.bf16.mxu0 %v4690_v0  ;;  %3518 = vmatprep.subr.bf16.mxu1 %v4690_v0 }
 0x211   : > { %3499 = vmatmul.mubr.msk.bf16.vlgmr.msra.gmra.mrb[4].mxu0 %vm883_vm1, %v5333_v6  ;;  %3507 = vmatmul.mubr.msk.bf16.vlgmr.msra.gmra.mrb[4].mxu1 %vm883_vm1, %v5333_v6 }
 0x212   : > { %3511 = vmatpush3.bf16.msra.mxu0 %v3958_v11  ;;  %3519 = vmatpush3.bf16.msra.mxu1 %v3959_v12 }
 0x213   : > { %3512 = vmatprep.subr.bf16.mxu0 %v4690_v0  ;;  %3520 = vmatprep.subr.bf16.mxu1 %v4690_v0 }
 0x214   : > { %3514 = vmatprep.mubr.msk.bf16.mxu0 %vm4691_vm0, %v4690_v0  ;;  %3522 = vmatprep.mubr.msk.bf16.mxu1 %vm4691_vm0, %v4690_v0 }
 0x216   : > { %3513 = vmatpush3.bf16.msra.mxu0 %v3960_v13  ;;  %3521 = vmatpush3.bf16.msra.mxu1 %v3961_v14 }
 0x217   : > { %3526 = vmatprep.subr.bf16.mxu0 %v4690_v0  ;;  %3534 = vmatprep.subr.bf16.mxu1 %v4690_v0 }
 0x219   : > { %3515 = vmatmul.mubr.msk.bf16.vlgmr.msra.gmra.mrb[8].mxu0 %vm883_vm1, %v5333_v6  ;;  %3523 = vmatmul.mubr.msk.bf16.vlgmr.msra.gmra.mrb[8].mxu1 %vm883_vm1, %v5333_v6 }
 0x21a   : > { %3527 = vmatpush3.bf16.msra.mxu0 %v3962_v15  ;;  %3535 = vmatpush3.bf16.msra.mxu1 %v3963_v16  ;;  %v3266_v15 = vld [vmem:[#allocation8 + $0x2] ss:$0 sm:$0xff] }
 0x21b   : > { %3528 = vmatprep.subr.bf16.mxu0 %v4690_v0  ;;  %3536 = vmatprep.subr.bf16.mxu1 %v4690_v0 }
 0x21c   : > { %3530 = vmatprep.mubr.msk.bf16.mxu0 %vm4691_vm0, %v4690_v0  ;;  %3538 = vmatprep.mubr.msk.bf16.mxu1 %vm4691_vm0, %v4690_v0 }
 0x21e   : > { %3529 = vmatpush3.bf16.msra.mxu0 %v3964_v17  ;;  %3537 = vmatpush3.bf16.msra.mxu1 %v3965_v18  ;;  %v3267_v18 = vld [vmem:[#allocation8 + $0x3] ss:$0 sm:$0xff] }
 0x21f   : > { %3542 = vmatprep.subr.bf16.mxu0 %v4690_v0  ;;  %3550 = vmatprep.subr.bf16.mxu1 %v4690_v0 }
 0x221   : > { %3531 = vmatmul.mubr.msk.bf16.vlgmr.msra.gmra.mrb[12].mxu0 %vm883_vm1, %v5333_v6  ;;  %3539 = vmatmul.mubr.msk.bf16.vlgmr.msra.gmra.mrb[12].mxu1 %vm883_vm1, %v5333_v6 }
 0x222   : > { %3543 = vmatpush3.bf16.msra.mxu0 %v3966_v19  ;;  %3546 = vmatprep.mubr.msk.bf16.mxu0 %vm4691_vm0, %v4690_v0 }
 0x223   : > { %3544 = vmatprep.subr.bf16.mxu0 %v4690_v0  ;;  %3554 = vmatprep.mubr.msk.bf16.mxu1 %vm4691_vm0, %v4690_v0 }
 0x224   : > { %3551 = vmatpush3.bf16.msra.mxu1 %v3967_v20 }
 0x225   : > { %3552 = vmatprep.subr.bf16.mxu1 %v4690_v0 }
 0x226   : > { %3545 = vmatpush3.bf16.msra.mxu0 %v3968_v21 }
 0x227   : > { %3558 = vmatprep.subr.bf16.mxu0 %v4690_v0 }
 0x228   : > { %3553 = vmatpush3.bf16.msra.mxu1 %v3969_v22 }
 0x229   : > { %3547 = vmatmul.mubr.msk.bf16.vlgmr.msra.gmra.mrb[16].mxu0 %vm883_vm1, %v5333_v6  ;;  %3566 = vmatprep.subr.bf16.mxu1 %v4690_v0 }
 0x22a   : > { %3562 = vmatprep.mubr.msk.bf16.mxu0 %vm4691_vm0, %v4690_v0  ;;  %3559 = vmatpush3.bf16.msra.mxu0 %v3970_v23 }
 0x22b   : > { %3555 = vmatmul.mubr.msk.bf16.vlgmr.msra.gmra.mrb[16].mxu1 %vm883_vm1, %v5333_v6  ;;  %3560 = vmatprep.subr.bf16.mxu0 %v4690_v0 }
 0x22c   : > { %3567 = vmatpush3.bf16.msra.mxu1 %v3971_v24  ;;  %3570 = vmatprep.mubr.msk.bf16.mxu1 %vm4691_vm0, %v4690_v0 }
 0x22d   : > { %3568 = vmatprep.subr.bf16.mxu1 %v4690_v0 }
 0x22e   : > { %3561 = vmatpush3.bf16.msra.mxu0 %v3972_v25  ;;  %v3296_v25 = vld [vmem:[#allocation14] ss:$0 sm:$0xff] }
 0x22f   : > { %3574 = vmatprep.subr.bf16.mxu0 %v4690_v0 }
 0x230   : > { %3569 = vmatpush3.bf16.msra.mxu1 %v3973_v26 }
 0x231   : > { %3580 = vmatprep.subr.bf16.mxu1 %v4690_v0  ;;  %3563 = vmatmul.mubr.msk.bf16.vlgmr.msra.gmra.mrb[20].mxu0 %vm883_vm1, %v5333_v6 }
 0x232   : > { %3576 = vmatprep.mubr.msk.bf16.mxu0 %vm4691_vm0, %v4690_v0 }
 0x233   : > { %3571 = vmatmul.mubr.msk.bf16.vlgmr.msra.gmra.mrb[20].mxu1 %vm883_vm1, %v5333_v6 }
 0x234   : > { %3582 = vmatprep.mubr.msk.bf16.mxu1 %vm4691_vm0, %v4690_v0 }
 0x2dc   : > { %v921_v27 = vpop.f32.mrb[0].mxu0  ;;  %v973_v29 = vpop.f32.mrb[0].mxu1 }
 0x2dd   : > { %v3484_v28 = vpop.f32.mrb[1].mxu0  ;;  %v3492_v31 = vpop.f32.mrb[1].mxu1  ;;  %v922_v62 = vadd.f32 %v3264_v55, %v921_v27  ;;  %v974_v1 = vadd.f32 %v3265_v58, %v973_v29  ;;  %v3297_v27 = vld [vmem:[#allocation14 + $0x1] ss:$0 sm:$0xff] }
 0x2de   : > { %v924_v30 = vpop.f32.mrb[2].mxu0  ;;  %v976_v33 = vpop.f32.mrb[2].mxu1 }
 0x2df   : > { %v3485_v32 = vpop.f32.mrb[3].mxu0  ;;  %v3493_v34 = vpop.f32.mrb[3].mxu1  ;;  %v1592_v10 = vpack.c.bf16 %v922_v62, %v922_v62  ;;  %v1593_v14 = vpack.c.bf16 %v974_v1, %v974_v1 }
 0x2e4   : > { %v1025_v35 = vpop.f32.mrb[4].mxu0  ;;  %v1077_v37 = vpop.f32.mrb[4].mxu1 }
 0x2e5   : > { %v3500_v36 = vpop.f32.mrb[5].mxu0  ;;  %v3508_v39 = vpop.f32.mrb[5].mxu1  ;;  %v1026_v21 = vadd.f32 %v3266_v15, %v1025_v35  ;;  %v1078_v22 = vadd.f32 %v3267_v18, %v1077_v37 }
 0x2e6   : > { %v1028_v38 = vpop.f32.mrb[6].mxu0  ;;  %v1080_v41 = vpop.f32.mrb[6].mxu1 }
 0x2e7   : > { %v3501_v40 = vpop.f32.mrb[7].mxu0  ;;  %v3509_v42 = vpop.f32.mrb[7].mxu1  ;;  %v1594_v23 = vpack.c.bf16 %v1026_v21, %v1026_v21  ;;  %v1595_v24 = vpack.c.bf16 %v1078_v22, %v1078_v22  ;;  %v3298_v41 = vld [vmem:[#allocation14 + $0x2] ss:$0 sm:$0xff] }
 0x2e8   : > { %v3299_v42 = vld [vmem:[#allocation14 + $0x3] ss:$0 sm:$0xff] }
 0x2ec   : > { %v1173_v45 = vpop.f32.mrb[8].mxu0  ;;  %v1225_v47 = vpop.f32.mrb[8].mxu1 }
 0x2ed   : > { %v1174_v46 = vadd.f32 %v3280_v43, %v1173_v45  ;;  %v3516_v48 = vpop.f32.mrb[9].mxu0  ;;  %v1226_v49 = vadd.f32 %v3281_v44, %v1225_v47  ;;  %v3524_v51 = vpop.f32.mrb[9].mxu1 }
 0x2ee   : > { %v1176_v50 = vpop.f32.mrb[10].mxu0  ;;  %v1228_v54 = vpop.f32.mrb[10].mxu1 }
 0x2ef   : > { %v1596_v52 = vpack.c.bf16 %v1174_v46, %v1174_v46  ;;  %v3517_v53 = vpop.f32.mrb[11].mxu0  ;;  %v1597_v56 = vpack.c.bf16 %v1226_v49, %v1226_v49  ;;  %v3525_v57 = vpop.f32.mrb[11].mxu1 }
 0x2f0   : > { %v1587_v57 = vlaneseq }
 0x2f1   : > { %v1605_v59 = vsel %vm1600_vm2, %v1596_v52, 0  ;;  %v1651_v60 = vsel %vm1600_vm2, %v1597_v56, 0 }
 0x2f2   : > { %3575 = vmatpush3.bf16.xpose.msra.mxu0 %v1605_v59  ;;  %3581 = vmatpush3.bf16.xpose.msra.mxu1 %v1651_v60  ;;  %v5435_v58 = vshrl.u32 %v1587_v57, 7  ;;  %v1590_v59 = vand.u32 127, %v1587_v57 }
 0x2f3   : > { %3586 = vmatprep.subr.bf16.mxu0 %v4690_v0  ;;  %3592 = vmatprep.subr.bf16.mxu1 %v4690_v0 }
 0x2f4   : > { %v1277_v2 = vpop.f32.mrb[12].mxu0  ;;  %v1329_v4 = vpop.f32.mrb[12].mxu1  ;;  %vm1591_vm4 = vcmp.le.s32.totalorder %v1590_v59, %v5435_v58 }
 0x2f5   : > { %v1278_v3 = vadd.f32 %v3282_v61, %v1277_v2  ;;  %v3532_v6 = vpop.f32.mrb[13].mxu0  ;;  %v1330_v7 = vadd.f32 %v3283_v63, %v1329_v4  ;;  %v3540_v9 = vpop.f32.mrb[13].mxu1 }
 0x2f6   : > { %v1280_v8 = vpop.f32.mrb[14].mxu0  ;;  %v1332_v13 = vpop.f32.mrb[14].mxu1 }
 0x2f7   : > { %v1598_v11 = vpack.c.bf16 %v1278_v3, %v1278_v3  ;;  %v3533_v12 = vpop.f32.mrb[15].mxu0  ;;  %v1599_v16 = vpack.c.bf16 %v1330_v7, %v1330_v7  ;;  %v3541_v17 = vpop.f32.mrb[15].mxu1 }
 0x2f9   : > { %v1697_v19 = vsel %vm1600_vm2, %v1598_v11, 0  ;;  %3577 = vmatmul.mubr.msk.bf16.vlgmr.msra.gmra.mrb[24].mxu0 %vm1600_vm2, %v1592_v10  ;;  %v1743_v20 = vsel %vm1600_vm2, %v1599_v16, 0  ;;  %3583 = vmatmul.mubr.msk.bf16.vlgmr.msra.gmra.mrb[24].mxu1 %vm1600_vm2, %v1593_v14 }
 0x2fa   : > { %3587 = vmatpush3.bf16.xpose.msra.mxu0 %v1697_v19  ;;  %3593 = vmatpush3.bf16.xpose.msra.mxu1 %v1743_v20 }
 0x2fb   : > { %3588 = vmatprep.mubr.msk.bf16.mxu0 %vm4691_vm0, %v4690_v0  ;;  %3594 = vmatprep.mubr.msk.bf16.mxu1 %vm4691_vm0, %v4690_v0 }
 0x2fc   : > { %3598 = vmatprep.subr.bf16.mxu0 %v4690_v0  ;;  %3604 = vmatprep.subr.bf16.mxu1 %v4690_v0  ;;  %v1425_v26 = vpop.f32.mrb[16].mxu0 }
 0x2fd   : > { %v1426_v28 = vadd.f32 %v3296_v25, %v1425_v26  ;;  %v3548_v29 = vpop.f32.mrb[17].mxu0 }
 0x2fe   : > { %v1428_v30 = vpop.f32.mrb[18].mxu0  ;;  %v1477_v31 = vpop.f32.mrb[16].mxu1 }
 0x2ff   : > { %v1843_v32 = vpack.c.bf16 %v1426_v28, %v1426_v28  ;;  %v3549_v33 = vpop.f32.mrb[19].mxu0  ;;  %v1478_v34 = vadd.f32 %v3297_v27, %v1477_v31  ;;  %v3556_v35 = vpop.f32.mrb[17].mxu1 }
 0x300   : > { %v1480_v36 = vpop.f32.mrb[18].mxu1 }
 0x301   : > { %3589 = vmatmul.mubr.msk.bf16.vlgmr.msra.gmra.mrb[28].mxu0 %vm1600_vm2, %v1594_v23  ;;  %3595 = vmatmul.mubr.msk.bf16.vlgmr.msra.gmra.mrb[28].mxu1 %vm1600_vm2, %v1595_v24  ;;  %v1852_v37 = vsel %vm1850_vm3, %v1843_v32, 0  ;;  %v1844_v38 = vpack.c.bf16 %v1478_v34, %v1478_v34  ;;  %v3557_v39 = vpop.f32.mrb[19].mxu1 }
 0x302   : > { %3600 = vmatprep.mubr.msk.bf16.mxu0 %vm4691_vm0, %v4690_v0  ;;  %3606 = vmatprep.mubr.msk.bf16.mxu1 %vm4691_vm0, %v4690_v0 }
 0x303   : > { %3599 = vmatpush3.bf16.msra.mxu0 %v1852_v37  ;;  %v1898_v40 = vsel %vm1850_vm3, %v1844_v38, 0 }
 0x304   : > { %3610 = vmatprep.subr.bf16.mxu0 %v4690_v0  ;;  %3605 = vmatpush3.bf16.msra.mxu1 %v1898_v40  ;;  %v1529_v43 = vpop.f32.mrb[20].mxu0 }
 0x305   : > { %3616 = vmatprep.subr.bf16.mxu1 %v4690_v0  ;;  %v1530_v45 = vadd.f32 %v3298_v41, %v1529_v43  ;;  %v3564_v46 = vpop.f32.mrb[21].mxu0 }
 0x306   : > { %v1581_v44 = vpop.f32.mrb[20].mxu1  ;;  %v1532_v49 = vpop.f32.mrb[22].mxu0 }
 0x307   : > { %v1582_v47 = vadd.f32 %v3299_v42, %v1581_v44  ;;  %v3572_v48 = vpop.f32.mrb[21].mxu1  ;;  %v1845_v51 = vpack.c.bf16 %v1530_v45, %v1530_v45  ;;  %v3565_v52 = vpop.f32.mrb[23].mxu0 }
 0x308   : > { %v1584_v50 = vpop.f32.mrb[22].mxu1 }
 0x309   : > { %v1846_v53 = vpack.c.bf16 %v1582_v47, %v1582_v47  ;;  %v3573_v54 = vpop.f32.mrb[23].mxu1  ;;  %v5430_v55 = vsel %vm1850_vm3, %v1845_v51, 0 }
 0x30b   : > { %v5433_v56 = vsel %vm1850_vm3, %v1846_v53, 0 }
 0x3cc   : > { %v1641_v60 = vpop.f32.mrb[24].mxu0  ;;  %v1687_v62 = vpop.f32.mrb[24].mxu1 }
 0x3cd   : > { %v1787_v61 = vsel %vm1591_vm4, %v1641_v60, -inf  ;;  %v3578_v63 = vpop.f32.mrb[25].mxu0  ;;  %v3584_v1 = vpop.f32.mrb[25].mxu1  ;;  %v1788_v4 = vsel %vm1591_vm4, %v1687_v62, -inf  ;;  %v3974_v60 = vld [vmem:[#allocation15] sm:$0xff]  }
 0x3ce   : > { %v1644_v2 = vpop.f32.mrb[26].mxu0  ;;  %v1791_v3 = vsel %vm1600_vm2, %v1787_v61, -inf  ;;  %v1690_v6 = vpop.f32.mrb[26].mxu1  ;;  %v1794_v9 = vsel %vm1600_vm2, %v1788_v4, -inf  ;;  %v3975_v63 = vld [vmem:[#allocation15 + $0x8] sm:$0xff]  }
 0x3cf   : > { %1792 = vmax.xlane.f32.xlu0 %v1791_v3  ;;  %v3579_v7 = vpop.f32.mrb[27].mxu0  ;;  %v3585_v8 = vpop.f32.mrb[27].mxu1 }
 0x3d3   : > { %1795 = vmax.xlane.f32.xlu0 %v1794_v9 }
 0x3d4   : > { %v1733_v10 = vpop.f32.mrb[28].mxu0  ;;  %v1779_v12 = vpop.f32.mrb[28].mxu1 }
 0x3d5   : > { %v1789_v11 = vsel %vm1591_vm4, %v1733_v10, -inf  ;;  %v3590_v13 = vpop.f32.mrb[29].mxu0  ;;  %v3596_v14 = vpop.f32.mrb[29].mxu1  ;;  %v1790_v17 = vsel %vm1591_vm4, %v1779_v12, -inf }
 0x3d6   : > { %v1736_v15 = vpop.f32.mrb[30].mxu0  ;;  %v1797_v16 = vsel %vm1600_vm2, %v1789_v11, -inf  ;;  %v1782_v18 = vpop.f32.mrb[30].mxu1  ;;  %v1800_v21 = vsel %vm1600_vm2, %v1790_v17, -inf }
 0x3d7   : > { %1798 = vmax.xlane.f32.xlu1 %v1797_v16  ;;  %v3591_v19 = vpop.f32.mrb[31].mxu0  ;;  %v3597_v20 = vpop.f32.mrb[31].mxu1 }
 0x3d8   : > { %v3320_v20 = vld [vmem:[#allocation17] ss:$0 sm:$0xff] }
 0x3db   : > { %1801 = vmax.xlane.f32.xlu1 %v1800_v21 }
 0x45c   : > { %v1793_v22 = vpop.xlane.xlu0 %1792 }
 0x45d   : > { %v1803_v23 = vsub.f32 %v1787_v61, %v1793_v22 }
 0x45f   : > { %v1807_v24 = vmul.f32 1.442695, %v1803_v23 }
 0x460   : > { %v1796_v25 = vpop.xlane.xlu0 %1795 }
 0x461   : > { %4022 = vpow2.f32 %v1807_v24  ;;  %v1804_v26 = vsub.f32 %v1788_v4, %v1796_v25 }
 0x463   : > { %v1809_v27 = vmul.f32 1.442695, %v1804_v26 }
 0x464   : > { %v1799_v28 = vpop.xlane.xlu1 %1798 }
 0x465   : > { %4024 = vpow2.f32 %v1809_v27  ;;  %v1805_v29 = vsub.f32 %v1789_v11, %v1799_v28 }
 0x467   : > { %v1811_v30 = vmul.f32 1.442695, %v1805_v29 }
 0x468   : > { %v1802_v31 = vpop.xlane.xlu1 %1801 }
 0x469   : > { %4026 = vpow2.f32 %v1811_v30  ;;  %v1806_v32 = vsub.f32 %v1790_v17, %v1802_v31 }
 0x46b   : > { %v4023_v33 = vpop.eup %4022  ;;  %v1813_v34 = vmul.f32 1.442695, %v1806_v32 }
 0x46c   : > { %v1815_v35 = vsel %vm1600_vm2, %v4023_v33, 0.0 }
 0x46d   : > { %4028 = vpow2.f32 %v1813_v34  ;;  %1816 = vadd.xlane.f32.xlu0 %v1815_v35  ;;  %v3976_v34 = vld [vmem:[#allocation24] ss:$16 sps:$4 sm:$0xff]  }
 0x46e   : > { %v3979_v35 = vld [vmem:[#allocation21] sm:$0xff]  }
 0x46f   : > { %v4025_v36 = vpop.eup %4024 }
 0x470   : > { %v1818_v37 = vsel %vm1600_vm2, %v4025_v36, 0.0 }
 0x471   : > { %1819 = vadd.xlane.f32.xlu1 %v1818_v37  ;;  %v3982_v37 = vld [vmem:[#allocation24 + $0x24] ss:$16 sps:$4 sm:$0xff]  }
 0x473   : > { %v4027_v38 = vpop.eup %4026 }
 0x474   : > { %v1821_v39 = vsel %vm1600_vm2, %v4027_v38, 0.0 }
 0x475   : > { %1822 = vadd.xlane.f32.xlu0 %v1821_v39  ;;  %v3986_v39 = vld [vmem:[#allocation24 + $0xc] ss:$16 sps:$4 sm:$0xff]  }
 0x477   : > { %v4029_v40 = vpop.eup %4028 }
 0x478   : > { %v1824_v41 = vsel %vm1600_vm2, %v4029_v40, 0.0 }
 0x479   : > { %1825 = vadd.xlane.f32.xlu1 %v1824_v41 }
 0x4fa   : > { %v1817_v42 = vpop.xlane.xlu0 %1816 }
 0x4fb   : > { %4030 = vrcp.f32 %v1817_v42 }
 0x4fe   : > { %v1820_v43 = vpop.xlane.xlu1 %1819 }
 0x4ff   : > { %4032 = vrcp.f32 %v1820_v43 }
 0x502   : > { %v1823_v44 = vpop.xlane.xlu0 %1822 }
 0x503   : > { %4034 = vrcp.f32 %v1823_v44  ;;  %v5490_v44 = vld [vmem:[#allocation18] ss:$0 sm:$0xff] }
 0x505   : > { %v4031_v45 = vpop.eup %4030 }
 0x506   : > { %v1831_v46 = vmul.f32 %v4031_v45, %v4023_v33  ;;  %v1826_v47 = vpop.xlane.xlu1 %1825  ;;  %v3978_v33 = vld [vmem:[#allocation24 + $0x4] ss:$16 sps:$4 sm:$0xff]  }
 0x507   : > { %4036 = vrcp.f32 %v1826_v47 }
 0x508   : > { %1835 = vst.msk [vmem:[%s5455_s24] sm:$0xff] %vm1600_vm2, %v1831_v46  ;;  %v1839_v48 = vpack.c.bf16 %v1831_v46, %v1831_v46  ;;  %v5492_v46 = vld [vmem:[#allocation20] ss:$0 sm:$0xff] }
 0x509   : > { %v4033_v49 = vpop.eup %4032 }
 0x50a   : > { %v1832_v50 = vmul.f32 %v4033_v49, %v4025_v36  ;;  %3601 = vmatmul.mubr.msk.bf16.vlgmr.msra.gmra.mrb[32].mxu0 %vm1600_vm2, %v1839_v48  ;;  %v3980_v36 = vld [vmem:[#allocation24 + $0x20] ss:$16 sps:$4 sm:$0xff]   ;;  %v3984_v49 = vld [vmem:[#allocation24 + $0x8] ss:$16 sps:$4 sm:$0xff]  }
 0x50b   : > { %3611 = vmatpush3.bf16.msra.mxu0 %v5430_v55  ;;  %3612 = vmatprep.mubr.msk.bf16.mxu0 %vm4691_vm0, %v4690_v0 }
 0x50c   : > { %1836 = vst.msk [vmem:[%s5455_s24 + $0x8] sm:$0xff] %vm1600_vm2, %v1832_v50  ;;  %v1840_v51 = vpack.c.bf16 %v1832_v50, %v1832_v50  ;;  %3622 = vmatprep.subr.bf16.mxu0 %v4690_v0 }
 0x50d   : > { %v4035_v52 = vpop.eup %4034 }
 0x50e   : > { %v1833_v53 = vmul.f32 %v4035_v52, %v4027_v38  ;;  %3607 = vmatmul.mubr.msk.bf16.vlgmr.msra.gmra.mrb[32].mxu1 %vm1600_vm2, %v1840_v51  ;;  %v3983_v38 = vld [vmem:[#allocation21 + $0x8] sm:$0xff]   ;;  %v3990_v52 = vld [vmem:[#allocation27] sm:$0xff]  }
 0x50f   : > { %3617 = vmatpush3.bf16.msra.mxu1 %v5433_v56  ;;  %3618 = vmatprep.mubr.msk.bf16.mxu1 %vm4691_vm0, %v4690_v0  ;;  %v3989_v51 = vld [vmem:[#allocation24 + $0x2c] ss:$16 sps:$4 sm:$0xff]  }
 0x510   : > { %1837 = vst.msk [vmem:[%s5455_s24 + $0x10] sm:$0xff] %vm1600_vm2, %v1833_v53  ;;  %v1841_v54 = vpack.c.bf16 %v1833_v53, %v1833_v53  ;;  %3630 = vmatprep.subr.bf16.mxu1 %v4690_v0  ;;  %v3987_v53 = vld [vmem:[#allocation24 + $0x28] ss:$16 sps:$4 sm:$0xff]  }
 0x511   : > { %v4037_v55 = vpop.eup %4036 }
 0x512   : > { %v1834_v57 = vmul.f32 %v4037_v55, %v4029_v40  ;;  %3613 = vmatmul.mubr.msk.bf16.vlgmr.msra.gmra.mrb[36].mxu0 %vm1600_vm2, %v1841_v54  ;;  %v3991_v54 = vld [vmem:[#allocation27 + $0x40] sm:$0xff]   ;;  %v3992_v55 = vld [vmem:[#allocation27 + $0x8] sm:$0xff]  }
 0x513   : > { %3626 = vmatprep.mubr.msk.bf16.mxu0 %vm4691_vm0, %v4690_v0  ;;  %3623 = vmatpush3.bf16.msra.mxu0 %v3974_v60  ;;  %v3996_v60 = vld [vmem:[#allocation27 + $0x18] sm:$0xff]  }
 0x514   : > { %1838 = vst.msk [vmem:[%s5455_s24 + $0x18] sm:$0xff] %vm1600_vm2, %v1834_v57  ;;  %v1842_v59 = vpack.c.bf16 %v1834_v57, %v1834_v57  ;;  %3624 = vmatprep.subr.bf16.mxu0 %v4690_v0  ;;  %v3993_v57 = vld [vmem:[#allocation27 + $0x48] sm:$0xff]  }
 0x516   : > { %3619 = vmatmul.mubr.msk.bf16.vlgmr.msra.gmra.mrb[36].mxu1 %vm1600_vm2, %v1842_v59  ;;  %v3994_v59 = vld [vmem:[#allocation27 + $0x10] sm:$0xff]  }
 0x517   : > { %3634 = vmatprep.mubr.msk.bf16.mxu1 %vm4691_vm0, %v4690_v0  ;;  %3625 = vmatpush3.bf16.msra.mxu0 %v3975_v63  ;;  %v3999_v63 = vld [vmem:[#allocation27 + $0x60] sm:$0xff]  }
 0x518   : > { %2320 = vmatprep.subr.bf16.mxu0 %v3978_v33  ;;  %3631 = vmatpush3.bf16.msra.mxu1 %v3979_v35 }
 0x519   : > { %3632 = vmatprep.subr.bf16.mxu1 %v4690_v0 }
 0x51c   : > { %3633 = vmatpush3.bf16.msra.mxu1 %v3983_v38 }
 0x51d   : > { %2361 = vmatprep.subr.bf16.mxu1 %v3986_v39 }
 0x5dd   : > { %v1888_v56 = vpop.f32.mrb[32].mxu0 }
 0x5de   : > { %2032 = vst.msk [vmem:[#allocation2] sm:$0xff] %vm1600_vm2, %v1888_v56  ;;  %v3602_v61 = vpop.f32.mrb[33].mxu0  ;;  %v3995_v56 = vld [vmem:[#allocation27 + $0x50] sm:$0xff]  }
 0x5df   : > { %v1891_v62 = vpop.f32.mrb[34].mxu0  ;;  %v3997_v61 = vld [vmem:[#allocation27 + $0x58] sm:$0xff]  }
 0x5e0   : > { %v3603_v1 = vpop.f32.mrb[35].mxu0  ;;  %v3998_v62 = vld [vmem:[#allocation27 + $0x20] sm:$0xff]  }
 0x5e1   : > { %v1934_v2 = vpop.f32.mrb[32].mxu1  ;;  %v4000_v1 = vld [vmem:[#allocation27 + $0x28] sm:$0xff]  }
 0x5e2   : > { %2034 = vrot.lane.b32.xlu0 %v1934_v2, %s5699_s2  ;;  %v3608_v3 = vpop.f32.mrb[33].mxu1  ;;  %v4001_v2 = vld [vmem:[#allocation27 + $0x68] sm:$0xff]   ;;  %s4540_s2 = sshll.u32 %s4699_s27, 4  ;;  %s4541_s2 = int_to_ptr.vmem [resolvable:$false] %s4540_s2 }
 0x5e3   : > { %v1937_v4 = vpop.f32.mrb[34].mxu1  ;;  %v4002_v3 = vld [vmem:[#allocation27 + $0x30] sm:$0xff]   ;;  %s4542_s3 = scalar_lea.vmem %s4541_s2, 1024  ;;  %p4543_p7 = scmp.lt.s32.totalorder %s5580_s18, %s4541_s2 }
 0x5e4   : > { %v3609_v6 = vpop.f32.mrb[35].mxu1  ;;  %v4003_v4 = vld [vmem:[#allocation27 + $0x70] sm:$0xff]  }
 0x5e5   : > { %v1980_v7 = vpop.f32.mrb[36].mxu0  ;;  %v4004_v6 = vld [vmem:[#allocation27 + $0x38] sm:$0xff]  }
 0x5e6   : > { %2040 = vrot.lane.b32.xlu1 %v1980_v7, %s4693_s1  ;;  %v3614_v8 = vpop.f32.mrb[37].mxu0  ;;  %v4005_v7 = vld [vmem:[#allocation27 + $0x78] sm:$0xff]   ;;  %s2940_s1 = scalar_lea.sflag [#allocation32], %s5276_s21 }
 0x5e7   : > { %v1983_v9 = vpop.f32.mrb[38].mxu0  ;;  %v2262_v8 = vsub.s32 0, %v5435_v58 }
 0x5e8   : > { %v3615_v10 = vpop.f32.mrb[39].mxu0  ;;  %v2258_v9 = vld [vmem:[#allocation26] sm:$0xf] }
 0x5e9   : > { %v2026_v11 = vpop.f32.mrb[36].mxu1  ;;  %v2266_v10 = vsub.s32 1, %v5435_v58 }
 0x5ea   : > { %v3620_v12 = vpop.f32.mrb[37].mxu1  ;;  %2046 = vrot.lane.b32.xlu1 %v2026_v11, %s4694_s22  ;;  %v2263_v11 = vrot.slane %v2258_v9, %v2262_v8  ;;  %v4010_v8 = vld [vmem:[#allocation27 + $0x90] sm:$0xff]   ;;  %s4536_s22 = scalar_lea.vmem %s5580_s18, 512 }
 0x5eb   : > { %v2029_v13 = vpop.f32.mrb[38].mxu1  ;;  %v3326_v12 = vld [vmem:[#allocation23] ss:$0 sm:$0xff]  ;;  %p4537_p11 = scmp.ne.s32.totalorder %s5580_s18, %s4536_s22  ;;  %p4544_p4 = scmp.lt.s32.totalorder %s4542_s3, %s4536_s22 }
 0x5ec   : > { %v3621_v14 = vpop.f32.mrb[39].mxu1  ;;  %v2267_v13 = vrot.slane %v2258_v9, %v2266_v10  ;;  %v4011_v10 = vld [vmem:[#allocation27 + $0xd0] sm:$0xff]  }
 0x5ed   : > { %p4538_p5 = pnand %p4537_p11, %p5761_p8  ;;  %p4545_p12 = por %p4544_p4, %p4543_p7 }
 0x5ef   : > { %p4539_p9 = pneg %p4538_p5 }
 0x5f1   : > { %p4546_p1 = pnand %p4545_p12, %p4539_p9 }
 0x654   : > { %v2035_v15 = vpop.permute.xlu0 %2034 }
 0x655   : > { %2038 = vst.msk [vmem:[#allocation2] sm:$0xff] %vm2037_vm5, %v2035_v15 }
 0x658   : > { %v2041_v16 = vpop.permute.xlu1 %2040 }
 0x659   : > { %2044 = vst.msk [vmem:[#allocation2] sm:$0xff] %vm2043_vm6, %v2041_v16 }
 0x65c   : > { %v2047_v17 = vpop.permute.xlu1 %2046 }
 0x65d   : > { %2050 = vst.msk [vmem:[#allocation2] sm:$0xff] %vm2049_vm7, %v2047_v17 }
 0x664   : > { %v2051_v18 = vld [vmem:[#allocation2] sm:$0xff] }
 0x665   : > { %v2052_v19 = vpack.c.bf16 %v2051_v18, %v2051_v18 }
 0x667   : > { %3627 = vmatmul.mubr.msk.bf16.vlgmr.msra.gmra.mrb[40].mxu0 %vm883_vm1, %v2052_v19 }
 0x668   : > { %2321 = vmatpush1.bf16.msra.mxu0 %v3976_v34  ;;  %v2274_v34 = vsub.s32 3, %v5435_v58 }
 0x669   : > { %2322 = vmatprep.subr.bf16.mxu0 %v3982_v37 }
 0x66c   : > { %2323 = vmatpush1.bf16.msra.mxu0 %v3980_v36 }
 0x66d   : > { %3638 = vmatprep.subr.bf16.mxu0 %v4690_v0 }
 0x73a   : > { %v2113_v21 = vpop.f32.mrb[40].mxu0 }
 0x73b   : > { %v2114_v22 = vadd.f32 %v3320_v20, %v2113_v21  ;;  %v3628_v23 = vpop.f32.mrb[41].mxu0 }
 0x73c   : > { %v2116_v24 = vpop.f32.mrb[42].mxu0 }
 0x73d   : > { %v3629_v25 = vpop.f32.mrb[43].mxu0  ;;  %v2121_v26 = vadd.f32 %v2114_v22, %v5329_v5  ;;  %v4695_v5 = vmov 0  }
 0x73e   : > { %2352 = vmatprep.mubr.bf16.mxu0 %v4695_v5  ;;  %3945 = vset.pattern.permute.xlu1 %v4695_v5 }
 0x73f   : > { %v2122_v27 = vsel %vm883_vm1, %v2121_v26, 0.0 }
 0x740   : > { %2123 = vadd.xlane.f32.xlu1 %v2122_v27 }
 0x7cd   : > { %v2124_v28 = vpop.xlane.xlu1 %2123 }
 0x7ce   : > { %v2126_v29 = vmul.f32 0.03125, %v2124_v28 }
 0x7d0   : > { %v2127_v30 = vsub.f32 %v2121_v26, %v2126_v29 }
 0x7d2   : > { %v2128_v31 = vmul.f32 %v2127_v30, %v2127_v30 }
 0x7d4   : > { %v2129_v32 = vsel %vm883_vm1, %v2128_v31, 0.0  ;;  %v2270_v31 = vsub.s32 2, %v5435_v58 }
 0x7d5   : > { %2130 = vadd.xlane.f32.xlu0 %v2129_v32 }
 0x862   : > { %v2131_v40 = vpop.xlane.xlu0 %2130 }
 0x863   : > { %v2132_v41 = vmul.f32 0.03125, %v2131_v40 }
 0x865   : > { %v2133_v42 = vadd.f32 1e-05, %v2132_v41  ;;  %v2275_v41 = vrot.slane %v2258_v9, %v2274_v34 }
 0x867   : > { %4038 = vrsqrt.f32 %v2133_v42 }
 0x871   : > { %v4039_v43 = vpop.eup %4038 }
 0x872   : > { %v2135_v45 = vmul.f32 %v4039_v43, %v2127_v30 }
 0x874   : > { %v2142_v47 = vmul.f32 %v5490_v44, %v2135_v45 }
 0x876   : > { %v5496_v48 = vadd.f32 %v5492_v46, %v2142_v47 }
 0x878   : > { %v2150_v50 = vpack.c.bf16 %v5496_v48, %v5496_v48 }
 0x87a   : > { %3635 = vmatmul.mubr.msk.bf16.vlgmr.msra.gmra.mrb[40].mxu1 %vm883_vm1, %v2150_v50  ;;  %3338 = vmatmul.mubr.msk.bf16.vlgmr.msra.gmra.mrb[44].mxu0 %vm883_vm1, %v2150_v50 }
 0x87b   : > { %2362 = vmatpush1.bf16.msra.mxu1 %v3984_v49  ;;  %2393 = vmatprep.mubr.bf16.mxu1 %v4695_v5  ;;  %v2271_v5 = vrot.slane %v2258_v9, %v2270_v31 }
 0x87c   : > { %2363 = vmatprep.subr.bf16.mxu1 %v3989_v51  ;;  %3639 = vmatpush3.bf16.msra.mxu0 %v3990_v52 }
 0x87d   : > { %3640 = vmatprep.subr.bf16.mxu0 %v4690_v0  ;;  %3654 = vmatprep.mubr.msk.bf16.mxu0 %vm4691_vm0, %v4690_v0 }
 0x87f   : > { %2364 = vmatpush1.bf16.msra.mxu1 %v3987_v53 }
 0x880   : > { %3658 = vmatprep.subr.bf16.mxu1 %v4690_v0  ;;  %3641 = vmatpush3.bf16.msra.mxu0 %v3992_v55 }
 0x881   : > { %3642 = vmatprep.subr.bf16.mxu0 %v4690_v0 }
 0x882   : > { %3339 = vmatmul.mubr.msk.bf16.vlgmr.msra.gmra.mrb[44].mxu1 %vm883_vm1, %v2150_v50 }
 0x883   : > { %3659 = vmatpush3.bf16.msra.mxu1 %v3991_v54  ;;  %3674 = vmatprep.mubr.msk.bf16.mxu1 %vm4691_vm0, %v4690_v0 }
 0x884   : > { %3660 = vmatprep.subr.bf16.mxu1 %v4690_v0  ;;  %3643 = vmatpush3.bf16.msra.mxu0 %v3994_v59 }
 0x885   : > { %3644 = vmatprep.subr.bf16.mxu0 %v4690_v0 }
 0x887   : > { %3661 = vmatpush3.bf16.msra.mxu1 %v3993_v57 }
 0x888   : > { %3662 = vmatprep.subr.bf16.mxu1 %v4690_v0  ;;  %3645 = vmatpush3.bf16.msra.mxu0 %v3996_v60  ;;  %v4006_v60 = vld [vmem:[#allocation27 + $0x80] sm:$0xff]  }
 0x889   : > { %3646 = vmatprep.subr.bf16.mxu0 %v4690_v0 }
 0x88b   : > { %3663 = vmatpush3.bf16.msra.mxu1 %v3995_v56 }
 0x88c   : > { %3664 = vmatprep.subr.bf16.mxu1 %v4690_v0  ;;  %3647 = vmatpush3.bf16.msra.mxu0 %v3998_v62 }
 0x88d   : > { %3648 = vmatprep.subr.bf16.mxu0 %v4690_v0 }
 0x88f   : > { %3665 = vmatpush3.bf16.msra.mxu1 %v3997_v61 }
 0x890   : > { %3666 = vmatprep.subr.bf16.mxu1 %v4690_v0  ;;  %3649 = vmatpush3.bf16.msra.mxu0 %v4000_v1  ;;  %v4007_v1 = vld [vmem:[#allocation27 + $0xc0] sm:$0xff]  }
 0x891   : > { %3650 = vmatprep.subr.bf16.mxu0 %v4690_v0 }
 0x893   : > { %3667 = vmatpush3.bf16.msra.mxu1 %v3999_v63 }
 0x894   : > { %3668 = vmatprep.subr.bf16.mxu1 %v4690_v0  ;;  %3651 = vmatpush3.bf16.msra.mxu0 %v4002_v3 }
 0x895   : > { %3652 = vmatprep.subr.bf16.mxu0 %v4690_v0 }
 0x897   : > { %3669 = vmatpush3.bf16.msra.mxu1 %v4001_v2 }
 0x898   : > { %3670 = vmatprep.subr.bf16.mxu1 %v4690_v0  ;;  %3653 = vmatpush3.bf16.msra.mxu0 %v4004_v6 }
 0x899   : > { %3678 = vmatprep.subr.bf16.mxu0 %v4690_v0 }
 0x89b   : > { %3671 = vmatpush3.bf16.msra.mxu1 %v4003_v4  ;;  %v4008_v4 = vld [vmem:[#allocation27 + $0x88] sm:$0xff]  }
 0x89c   : > { %3672 = vmatprep.subr.bf16.mxu1 %v4690_v0 }
 0x89f   : > { %3673 = vmatpush3.bf16.msra.mxu1 %v4005_v7  ;;  %v4009_v7 = vld [vmem:[#allocation27 + $0xc8] sm:$0xff]  }
 0x8a0   : > { %3698 = vmatprep.subr.bf16.mxu1 %v4690_v0 }
 0x94d   : > { %v2211_v14 = vpop.f32.mrb[40].mxu1  ;;  %v2354_v15 = vpop.f32.mrb[44].mxu0 }
 0x94e   : > { %v5526_v16 = vadd.f32 %v3326_v12, %v2211_v14  ;;  %v2355_v17 = vadd.f32 %v2354_v15, %v2263_v11  ;;  %v3636_v18 = vpop.f32.mrb[41].mxu1  ;;  %v2356_v19 = vpop.f32.mrb[45].mxu0  ;;  %v4012_v12 = vld [vmem:[#allocation27 + $0x98] sm:$0xff]   ;;  %v4014_v14 = vld [vmem:[#allocation27 + $0xa0] sm:$0xff]  }
 0x94f   : > { %v2357_v20 = vadd.f32 %v2356_v19, %v2267_v13  ;;  %v2214_v21 = vpop.f32.mrb[42].mxu1  ;;  %v2358_v22 = vpop.f32.mrb[46].mxu0  ;;  %v4013_v13 = vld [vmem:[#allocation27 + $0xd8] sm:$0xff]   ;;  %v4015_v15 = vld [vmem:[#allocation27 + $0xe0] sm:$0xff]   ;;  %v4017_v18 = vld [vmem:[#allocation27 + $0xe8] sm:$0xff]  }
 0x950   : > { %v2406_v23 = vmul.f32 0.044715, %v2355_v17  ;;  %v3637_v24 = vpop.f32.mrb[43].mxu1  ;;  %v2359_v25 = vpop.f32.mrb[47].mxu0  ;;  %v2218_v26 = vsel %vm2217_vm8, %v5526_v16, -inf  ;;  %v2402_v53 = vmul.f32 0.5, %v2355_v17 }
 0x951   : > { %v2407_v27 = vmul.f32 0.044715, %v2357_v20  ;;  %2219 = vmax.xlane.f32.xlu0 %v2218_v26  ;;  %v2403_v55 = vmul.f32 0.5, %v2357_v20  ;;  %v4018_v21 = vld [vmem:[#allocation27 + $0xb0] sm:$0xff]   ;;  %v4020_v26 = vld [vmem:[#allocation27 + $0xb8] sm:$0xff]  }
 0x952   : > { %v2410_v28 = vmul.f32 %v2406_v23, %v2355_v17  ;;  %v4019_v22 = vld [vmem:[#allocation27 + $0xf0] sm:$0xff]  }
 0x953   : > { %v2411_v29 = vmul.f32 %v2407_v27, %v2357_v20 }
 0x954   : > { %v2414_v30 = vmul.f32 %v2410_v28, %v2355_v17  ;;  %v4021_v28 = vld [vmem:[#allocation27 + $0xf8] sm:$0xff]  }
 0x955   : > { %v2415_v32 = vmul.f32 %v2411_v29, %v2357_v20  ;;  %v2395_v33 = vpop.f32.mrb[44].mxu1 }
 0x956   : > { %v2418_v35 = vadd.f32 %v2414_v30, %v2355_v17  ;;  %v2397_v36 = vpop.f32.mrb[45].mxu1  ;;  %v5532_v43 = vadd.f32 %v2395_v33, %v2271_v5  ;;  %v4016_v17 = vld [vmem:[#allocation27 + $0xa8] sm:$0xff]  }
 0x957   : > { %v2419_v37 = vadd.f32 %v2415_v32, %v2357_v20  ;;  %v2399_v38 = vpop.f32.mrb[46].mxu1  ;;  %v5534_v45 = vadd.f32 %v2397_v36, %v2275_v41 }
 0x958   : > { %v2400_v39 = vpop.f32.mrb[47].mxu1  ;;  %v2422_v40 = vmul.f32 0.7978846, %v2418_v35  ;;  %v2408_v47 = vmul.f32 0.044715, %v5532_v43  ;;  %v2404_v25 = vmul.f32 0.5, %v5532_v43 }
 0x959   : > { %v2423_v42 = vmul.f32 0.7978846, %v2419_v37  ;;  %v2409_v49 = vmul.f32 0.044715, %v5534_v45  ;;  %v2405_v27 = vmul.f32 0.5, %v5534_v45 }
 0x95a   : > { %4040 = vtanh.f32 %v2422_v40  ;;  %v2412_v50 = vmul.f32 %v2408_v47, %v5532_v43 }
 0x95b   : > { %4042 = vtanh.f32 %v2423_v42  ;;  %v2413_v52 = vmul.f32 %v2409_v49, %v5534_v45 }
 0x95c   : > { %v2416_v56 = vmul.f32 %v2412_v50, %v5532_v43 }
 0x95d   : > { %v2417_v62 = vmul.f32 %v2413_v52, %v5534_v45 }
 0x95e   : > { %v2420_v3 = vadd.f32 %v2416_v56, %v5532_v43 }
 0x95f   : > { %v2421_v6 = vadd.f32 %v2417_v62, %v5534_v45 }
 0x960   : > { %v2424_v9 = vmul.f32 0.7978846, %v2420_v3 }
 0x961   : > { %v2425_v11 = vmul.f32 0.7978846, %v2421_v6 }
 0x962   : > { %4044 = vtanh.f32 %v2424_v9 }
 0x963   : > { %4046 = vtanh.f32 %v2425_v11  ;;  %v4697_v11 = vmov 2  }
 0x964   : > { %v4041_v58 = vpop.eup %4040 }
 0x965   : > { %v4043_v51 = vpop.eup %4042  ;;  %v2430_v54 = vadd.f32 1.0, %v4041_v58 }
 0x966   : > { %v2431_v57 = vadd.f32 1.0, %v4043_v51 }
 0x967   : > { %v2434_v59 = vmul.f32 %v2430_v54, %v2402_v53 }
 0x968   : > { %v2435_v61 = vmul.f32 %v2431_v57, %v2403_v55 }
 0x969   : > { %v2438_v63 = vpack.c.bf16 %v2434_v59, %v2434_v59 }
 0x96a   : > { %v2439_v2 = vpack.c.bf16 %v2435_v61, %v2435_v61 }
 0x96b   : > { %3655 = vmatmul.mubr.bf16.vlgmr.msra.gmra.mrb[48].mxu0 %v2438_v63 }
 0x96c   : > { %3679 = vmatpush3.bf16.msra.mxu0 %v4006_v60  ;;  %3675 = vmatmul.mubr.bf16.vlgmr.msra.gmra.mrb[48].mxu1 %v2439_v2  ;;  %v4045_v19 = vpop.eup %4044 }
 0x96d   : > { %3699 = vmatpush3.bf16.msra.mxu1 %v4007_v1  ;;  %3680 = vmatprep.subr.bf16.mxu0 %v4690_v0  ;;  %v4047_v20 = vpop.eup %4046  ;;  %v2432_v23 = vadd.f32 1.0, %v4045_v19 }
 0x96e   : > { %3700 = vmatprep.subr.bf16.mxu1 %v4690_v0  ;;  %3694 = vmatprep.mubr.msk.bf16.mxu0 %vm4691_vm0, %v4690_v0  ;;  %v2433_v24 = vadd.f32 1.0, %v4047_v20  ;;  %v3358_v20 = vld [vmem:[#allocation29 + $0x2] ss:$0 sm:$0xff] }
 0x96f   : > { %3714 = vmatprep.mubr.msk.bf16.mxu1 %vm4691_vm0, %v4690_v0  ;;  %v2436_v29 = vmul.f32 %v2432_v23, %v2404_v25 }
 0x970   : > { %3681 = vmatpush3.bf16.msra.mxu0 %v4008_v4  ;;  %v2437_v30 = vmul.f32 %v2433_v24, %v2405_v27 }
 0x971   : > { %3701 = vmatpush3.bf16.msra.mxu1 %v4009_v7  ;;  %3682 = vmatprep.subr.bf16.mxu0 %v4690_v0  ;;  %v2440_v31 = vpack.c.bf16 %v2436_v29, %v2436_v29  ;;  %v4696_v7 = vmov 1  }
 0x972   : > { %3702 = vmatprep.subr.bf16.mxu1 %v4690_v0  ;;  %v2441_v32 = vpack.c.bf16 %v2437_v30, %v2437_v30  ;;  %3946 = vset.pattern.permute.xlu0 %v4696_v7 }
 0x974   : > { %3683 = vmatpush3.bf16.msra.mxu0 %v4010_v8 }
 0x975   : > { %3703 = vmatpush3.bf16.msra.mxu1 %v4011_v10  ;;  %3684 = vmatprep.subr.bf16.mxu0 %v4690_v0 }
 0x976   : > { %3704 = vmatprep.subr.bf16.mxu1 %v4690_v0 }
 0x978   : > { %3685 = vmatpush3.bf16.msra.mxu0 %v4012_v12  ;;  %v4698_v12 = vmov 3  }
 0x979   : > { %3705 = vmatpush3.bf16.msra.mxu1 %v4013_v13  ;;  %3686 = vmatprep.subr.bf16.mxu0 %v4690_v0  ;;  %v3340_v13 = vld [vmem:[#allocation29] ss:$0 sm:$0xff] }
 0x97a   : > { %3706 = vmatprep.subr.bf16.mxu1 %v4690_v0 }
 0x97c   : > { %3687 = vmatpush3.bf16.msra.mxu0 %v4014_v14  ;;  %v3349_v14 = vld [vmem:[#allocation29 + $0x1] ss:$0 sm:$0xff] }
 0x97d   : > { %3707 = vmatpush3.bf16.msra.mxu1 %v4015_v15  ;;  %3688 = vmatprep.subr.bf16.mxu0 %v4690_v0 }
 0x97e   : > { %3708 = vmatprep.subr.bf16.mxu1 %v4690_v0 }
 0x980   : > { %3689 = vmatpush3.bf16.msra.mxu0 %v4016_v17 }
 0x981   : > { %3709 = vmatpush3.bf16.msra.mxu1 %v4017_v18  ;;  %3690 = vmatprep.subr.bf16.mxu0 %v4690_v0 }
 0x982   : > { %3710 = vmatprep.subr.bf16.mxu1 %v4690_v0 }
 0x984   : > { %3691 = vmatpush3.bf16.msra.mxu0 %v4018_v21 }
 0x985   : > { %3711 = vmatpush3.bf16.msra.mxu1 %v4019_v22  ;;  %3692 = vmatprep.subr.bf16.mxu0 %v4690_v0 }
 0x986   : > { %3712 = vmatprep.subr.bf16.mxu1 %v4690_v0 }
 0x988   : > { %3693 = vmatpush3.bf16.msra.mxu0 %v4020_v26  ;;  %v3367_v26 = vld [vmem:[#allocation29 + $0x3] ss:$0 sm:$0xff] }
 0x989   : > { %3713 = vmatpush3.bf16.msra.mxu1 %v4021_v28 }
 0x98b   : > { %3695 = vmatmul.mubr.bf16.vlgmr.msra.gmra.mrb[52].mxu0 %v2440_v31 }
 0x98c   : > { %3715 = vmatmul.mubr.bf16.vlgmr.msra.gmra.mrb[52].mxu1 %v2441_v32 }
 0x9de   : > { %v2220_v33 = vpop.xlane.xlu0 %2219 }
 0x9df   : > { %v2221_v34 = vsub.f32 %v5526_v16, %v2220_v33 }
 0x9e1   : > { %v2222_v35 = vmul.f32 1.442695, %v2221_v34 }
 0x9e3   : > { %4048 = vpow2.f32 %v2222_v35 }
 0x9ed   : > { %v4049_v36 = vpop.eup %4048 }
 0x9ee   : > { %v2224_v37 = vsel %vm2217_vm8, %v4049_v36, 0.0 }
 0x9ef   : > { %2225 = vadd.xlane.f32.xlu0 %v2224_v37 }
 0xa3e   : > { %v2547_v38 = vpop.f32.mrb[48].mxu0 }
 0xa3f   : > { %v3656_v5 = vpop.f32.mrb[49].mxu0  ;;  %v2667_v39 = vpop.f32.mrb[48].mxu1  ;;  %v2548_v15 = vadd.f32 %v3340_v13, %v2547_v38 }
 0xa40   : > { %v2550_v0 = vpop.f32.mrb[50].mxu0  ;;  %v3676_v40 = vpop.f32.mrb[49].mxu1  ;;  %v2668_v17 = vadd.f32 %v3349_v14, %v2667_v39 }
 0xa41   : > { %v3657_v41 = vpop.f32.mrb[51].mxu0  ;;  %v2670_v42 = vpop.f32.mrb[50].mxu1 }
 0xa42   : > { %v3677_v43 = vpop.f32.mrb[51].mxu1 }
 0xa5e   : > { %v2786_v45 = vpop.f32.mrb[52].mxu0 }
 0xa5f   : > { %v3696_v47 = vpop.f32.mrb[53].mxu0  ;;  %v2905_v49 = vpop.f32.mrb[52].mxu1  ;;  %v2787_v24 = vadd.f32 %v3358_v20, %v2786_v45 }
 0xa60   : > { %v2789_v58 = vpop.f32.mrb[54].mxu0  ;;  %v3716_v50 = vpop.f32.mrb[53].mxu1  ;;  %v2906_v29 = vadd.f32 %v3367_v26, %v2905_v49 }
 0xa61   : > { %v3697_v16 = vpop.f32.mrb[55].mxu0  ;;  %v2908_v51 = vpop.f32.mrb[54].mxu1 }
 0xa62   : > { %v3717_v52 = vpop.f32.mrb[55].mxu1 }
 0xa7c   : > { %v2226_v53 = vpop.xlane.xlu0 %2225 }
 0xa7d   : > { %4050 = vrcp.f32 %v2226_v53 }
 0xa87   : > { %v4051_v54 = vpop.eup %4050 }
 0xa88   : > { %v2228_v55 = vmul.f32 %v4051_v54, %v4049_v36 }
 0xa8a   : > { %v2229_v57 = vsel %vm2217_vm8, %v2228_v55, -inf }
 0xa8b   : > { %2230 = vmax.xlane.f32.xlu1 %v2229_v57 }
 0xb18   : > { %v2231_v59 = vpop.xlane.xlu1 %2230 }
 0xb19   : > { %vm2232_vm9 = vcmp.ge.f32.partialorder %v2228_v55, %v2231_v59 }
 0xb1a   : > { %v2233_v56 = vsel %vm2232_vm9, -inf, %v2228_v55 }
 0xb1b   : > { %v2234_v60 = vsel %vm2217_vm8, %v2233_v56, -inf }
 0xb1c   : > { %2235 = vmax.xlane.f32.xlu0 %v2234_v60 }
 0xba9   : > { %v2236_v61 = vpop.xlane.xlu0 %2235 }
 0xbaa   : > { %vm2237_vm10 = vcmp.ge.f32.partialorder %v2228_v55, %v2236_v61 }
 0xbab   : > { %v2238_v62 = vsel %vm2237_vm10, %v2228_v55, -inf }
 0xbac   : > { %v2239_v63 = vsel %vm2217_vm8, %v2238_v62, -inf }
 0xbad   : > { %2240 = vmax.xlane.f32.xlu1 %v2239_v63 }
 0xc3a   : > { %v2241_v1 = vpop.xlane.xlu1 %2240 }
 0xc3b   : > { %v2242_v2 = vsub.f32 %v2238_v62, %v2241_v1 }
 0xc3d   : > { %v2243_v3 = vmul.f32 1.442695, %v2242_v2 }
 0xc3f   : > { %4052 = vpow2.f32 %v2243_v3 }
 0xc49   : > { %v4053_v4 = vpop.eup %4052 }
 0xc4a   : > { %v2245_v6 = vsel %vm2217_vm8, %v4053_v4, 0.0 }
 0xc4b   : > { %2246 = vadd.xlane.f32.xlu0 %v2245_v6 }
 0xcd8   : > { %v2247_v8 = vpop.xlane.xlu0 %2246 }
 0xcd9   : > { %4054 = vrcp.f32 %v2247_v8 }
 0xce3   : > { %v4055_v9 = vpop.eup %4054 }
 0xce4   : > { %v2249_v10 = vmul.f32 %v4055_v9, %v4053_v4 }
 0xce6   : > { %2674 = vperm.xlu0 %3946, %v2249_v10   ;;  %2555 = vperm.xlu1 %3945, %v2249_v10  }
 0xcea   : > { %3947 = vset.pattern.permute.xlu1 %v4697_v11  ;;  %3949 = vset.pattern.permute.xlu0 %v4698_v12 }
 0xceb   : > { %2793 = vperm.xlu1 %3947, %v2249_v10  }
 0xcef   : > { %3948 = vset.pattern.permute.xlu1 %v4698_v12 }
 0xcf0   : > { %2912 = vperm.xlu1 %3948, %v2249_v10  }
 0xd65   : > { %v2675_v18 = vpop.permute.xlu0 %2674  ;;  %v2556_v19 = vpop.permute.xlu1 %2555 }
 0xd66   : > { %v2677_v21 = vmul.f32 %v2675_v18, %v2668_v17  ;;  %v2558_v22 = vmul.f32 %v2556_v19, %v2548_v15 }
 0xd68   : > { %v2678_v23 = vadd.f32 %v2677_v21, %v2558_v22 }
 0xd6a   : > { %v2794_v25 = vpop.permute.xlu1 %2793 }
 0xd6b   : > { %v2796_v27 = vmul.f32 %v2794_v25, %v2787_v24 }
 0xd6d   : > { %v2797_v28 = vadd.f32 %v2796_v27, %v2678_v23 }
 0xd6f   : > { %v2913_v30 = vpop.permute.xlu1 %2912 }
 0xd70   : > { %v2915_v31 = vmul.f32 %v2913_v30, %v2906_v29 }
 0xd72   : > { %v2916_v32 = vadd.f32 %v2915_v31, %v2797_v28 }
 0xd74   : > { %v2917_v33 = vadd.f32 %v2916_v32, %v5496_v48 }
 0xd76   : > { %v2918_v34 = vsel %vm883_vm1, %v2917_v33, 0.0 }
 0xd77   : > { %2919 = vadd.xlane.f32.xlu1 %v2918_v34 }
 0xe04   : > { %v2920_v35 = vpop.xlane.xlu1 %2919 }
 0xe05   : > { %v2921_v36 = vmul.f32 0.03125, %v2920_v35 }
 0xe07   : > { %v2922_v37 = vsub.f32 %v2917_v33, %v2921_v36 }
 0xe09   : > { %v2923_v38 = vmul.f32 %v2922_v37, %v2922_v37 }
 0xe0b   : > { %v2924_v5 = vsel %vm883_vm1, %v2923_v38, 0.0 }
 0xe0c   : > { %2925 = vadd.xlane.f32.xlu0 %v2924_v5 }
 0xe0d   : > { %4549 = shalt.err (!%p4546_p1)
}
 0xe0e   : > { %s4550_s24 = scalar_lea.hbm %s5577_s17, 512  ;;  %s4554_s27 = scalar_lea.hbm %s5760_s25, 1024 }
 0xe0f   : > { %p4551_p13 = scmp.ne.s32.totalorder %s5577_s17, %s4550_s24  ;;  %p4555_p3 = scmp.lt.u32.totalorder %s5577_s17, %s5760_s25 }
 0xe10   : > { %p4556_p6 = scmp.lt.u32.totalorder %s4554_s27, %s4550_s24  ;;  %p4558_p11 = scmp.lt.u32.totalorder %s4550_s24, %s5577_s17 }
 0xe11   : > { %p4552_p0 = pnand %p4551_p13, %p5761_p8 }
 0xe12   : > { %p4557_p10 = por %p4556_p6, %p4555_p3 }
 0xe13   : > { %p4553_p2 = pneg %p4552_p0 }
 0xe14   : > { %p4559_p5 = por %p4558_p11, %p4557_p10 }
 0xe16   : > { %p4560_p9 = pnand %p4559_p5, %p4553_p2 }
 0xe18   : > { %4563 = shalt.err (!%p4560_p9)
}
 0xe19   : > { %s4700_s3 = smov 128   ;;  %s5762_s22 = smov 8  }
 0xe1a   : > { %3785 = dma.vmem_to_hbm [thread:$0]  (%p5761_p8), %s5580_s18, 512, %s5577_s17, %s2940_s1, %s4700_s3, %s4700_s3, %s5762_s22  }
 0xe1b   : > { %s3378_s24 = sshll.u32 %s5743_s4, 7  ;;  %s5763_s28 = sshll.u32 %s5276_s21, 3 }
 0xe1c   : > { %s816_s0 = scalar_lea.vmem [#allocation30], %s5763_s28  ;;  %s5764_s5 = sld [smem:[#allocation57_spill]] }
 0xe1d   : > { %s2953_s27 = sshll.u32 %s816_s0, 4  ;;  %s2935_s4 = scalar_lea.sflag [#allocation5], %s5276_s21  ;;  %s5617_s27 = int_to_ptr.vmem [resolvable:$true] %s2953_s27 }
 0xe1e   : > { %s4564_s17 = scalar_lea.vmem %s5617_s27, 128  ;;  %s4701_s18 = smov [#allocation30]  }
 0xe1f   : > { %p4565_p7 = scmp.ne.s32.totalorder %s5617_s27, %s4564_s17  ;;  %s4568_s1 = sshll.u32 %s4701_s18, 4  ;;  %s4569_s1 = int_to_ptr.vmem [resolvable:$false] %s4568_s1 }
 0xe20   : > { %s4570_s3 = scalar_lea.vmem %s4569_s1, 256  ;;  %p4571_p1 = scmp.lt.s32.totalorder %s5617_s27, %s4569_s1 }
 0xe21   : > { %p4566_p4 = pnand %p4565_p7, %p5761_p8  ;;  %p4572_p13 = scmp.lt.s32.totalorder %s4570_s3, %s4564_s17 }
 0xe22   : > { %s5615_s6 = scalar_lea.hbm %s5764_s5, %s3378_s24 }
 0xe23   : > { %p4567_p12 = pneg %p4566_p4  ;;  %p4573_p0 = por %p4572_p13, %p4571_p1 }
 0xe25   : > { %p4574_p2 = pnand %p4573_p0, %p4567_p12 }
 0xe99   : > { %v2926_v48 = vpop.xlane.xlu0 %2925 }
 0xe9a   : > { %v2927_v39 = vmul.f32 0.03125, %v2926_v48 }
 0xe9c   : > { %v2928_v0 = vadd.f32 1e-05, %v2927_v39 }
 0xe9e   : > { %4056 = vrsqrt.f32 %v2928_v0 }
 0xea8   : > { %v4057_v40 = vpop.eup %4056 }
 0xea9   : > { %v2930_v41 = vmul.f32 %v4057_v40, %v2922_v37 }
 0xeab   : > { %v2931_v42 = vmul.f32 %v5490_v44, %v2930_v41 }
 0xead   : > { %v2932_v43 = vadd.f32 %v5492_v46, %v2931_v42 }
 0xeaf   : > { %2933 = vst.msk [vmem:[%s816_s0] sm:$0xff] %vm883_vm1, %v2932_v43 }
 0xeb0   : > { %4577 = shalt.err (!%p4574_p2)
}
 0xeb1   : > { %s4578_s21 = scalar_lea.hbm %s5615_s6, 128  ;;  %s4582_s28 = scalar_lea.hbm %s5764_s5, 256 }
 0xeb2   : > { %p4579_p3 = scmp.ne.s32.totalorder %s5615_s6, %s4578_s21  ;;  %p4583_p11 = scmp.lt.u32.totalorder %s5615_s6, %s5764_s5 }
 0xeb3   : > { %p4584_p5 = scmp.lt.u32.totalorder %s4582_s28, %s4578_s21  ;;  %p4586_p7 = scmp.lt.u32.totalorder %s4578_s21, %s5615_s6 }
 0xeb4   : > { %p4580_p6 = pnand %p4579_p3, %p5761_p8 }
 0xeb5   : > { %p4585_p9 = por %p4584_p5, %p4583_p11 }
 0xeb6   : > { %p4581_p10 = pneg %p4580_p6 }
 0xeb7   : > { %p4587_p4 = por %p4586_p7, %p4585_p9 }
 0xeb9   : > { %p4588_p12 = pnand %p4587_p4, %p4581_p10 }
 0xebb   : > { %4591 = shalt.err (!%p4588_p12)
}
 0xebc   : > { %3784 = dma.vmem_to_hbm [thread:$0]  (%p5761_p8), %s5617_s27, 128, %s5615_s6, %s2935_s4  }
 0xebd PF: > { %s5765_s2 = sld [smem:[#allocation44_spill]]  ;;  %s5766_s17 = sld [smem:[#allocation47_spill]] }
 0xebe   : > { %p5767_p1 = scmp.ne.s32.totalorder %s5736_s19, 0 }
 0xec3   : > { %s2981_s18 = sand.u32 1, %s5765_s2   ;;  %p5768_p13 = scmp.ge.s32.totalorder %s5766_s17, 2 }
 0xec4   : > { %s2982_s1 = scalar_lea.sflag [#allocation5], %s2981_s18 }
 0xec5   : > { %p3842_p0 = pnand %p5768_p13, %p5767_p1 }
 0xec7   : > { %4645 = dma.done.wait (!%p3842_p0), %s2982_s1, 128  }
 0xec8   : > { %4647 = vsyncadd (!%p3842_p0), %s2982_s1, 4294967168  ;;  %s2991_s3 = scalar_lea.sflag [#allocation32], %s2981_s18 }
 0xec9   : > { %4649 = dma.done.wait (!%p3842_p0), %s2991_s3, 512  }
 0xeca   : > { %4651 = vsyncadd (!%p3842_p0), %s2991_s3, 4294966784  ;;  %s5769_s27 = sld [smem:[#allocation45_spill]]  ;;  %s5770_s28 = sld [smem:[#allocation46_spill]] }
 0xecb   : > { %p43_p8 = scmp.ge.s32.totalorder %s5206_s30, 4   ;;  %s5771_s29 = smov %s5218_s23 }
 0xecd   :  { %45 = sbr.rel (!%p43_p8) target bundleno = 25 (0x19), region = 220 }
 0xed4   :  { %2996 = vsyncpa [#allocation4], 1 }
 0xed5   :  { %2998 = vsyncpa [#allocation4 + $0x1], 1 }
 0xed6   :  { %2999 = vsyncpa [#allocation7], 1 }
 0xed7   :  { %3000 = vsyncpa [#allocation10], 1 }
 0xed8   :  { %3001 = vsyncpa [#allocation13], 1 }
 0xed9   :  { %3002 = vsyncpa [#allocation16], 1 }
 0xeda   :  { %3003 = vsyncpa [#allocation19], 1 }
 0xedb   :  { %3004 = vsyncpa [#allocation22], 1 }
 0xedc   :  { %3005 = vsyncpa [#allocation25], 1 }
 0xedd   :  { %3006 = vsyncpa [#allocation28], 1 }
 0xede   :  { %3007 = vsyncpa [#allocation5], 1 }
 0xedf   :  { %3009 = vsyncpa [#allocation5 + $0x1], 1 }
 0xee0   :  { %3010 = vsyncpa [#allocation32], 1 }
 0xee1   :  { %3012 = vsyncpa [#allocation32 + $0x1], 1 }

</bundles_post_ra>
